<compile_context>
chip_gen: v6e
topology: v6e:2x2x1
jax: 0.10.0
libtpu: 0.0.40
codegen_flags: <defaults>
</compile_context>

<pallas_src>
import functools
import math

import jax
import jax.numpy as jnp
from jax import lax
from jax.experimental import pallas as pl
from jax.experimental.pallas import tpu as pltpu


# ----------------------------------------------------------------------------
# helpers
# ----------------------------------------------------------------------------
def _round_up(v, m):
    return ((v + m - 1) // m) * m


def _pad_axis(a, target, axis):
    pad = target - a.shape[axis]
    if pad == 0:
        return a
    widths = [(0, 0)] * a.ndim
    widths[axis] = (0, pad)
    return jnp.pad(a, widths)


def _pad2(a, rows, cols):
    return _pad_axis(_pad_axis(a, rows, 0), cols, 1)


# ----------------------------------------------------------------------------
# The single fused forward kernel.
# refs = (x, noise_w, noise_z, logsigma_clipped,
#         [W, shift] * Lq            (Qwz, last layer lane-aligned),
#         W_w, W_z, W_x, shift0,     (Qy first layer, concat-free)
#         [W, shift] * (Lq-1)        (Qy rest),
#         [W, shift] * Lp            (Px),
#         [W, shift] * Lp            (Pz),
#         wz_out, w_out, z_out, qy_out, rec_out, zw_out, logprob_out)
# acts_q / acts_p are static tuples of Python bools (trace-time branches).
# ----------------------------------------------------------------------------
def _aae_forward_kernel(*refs, nw, nz, nclasses, nx, wgp, zgp, acts_q, acts_p):
    it = iter(refs)
    x_ref = next(it)
    noise_w_ref = next(it)
    noise_z_ref = next(it)
    logsig_ref = next(it)
    Lq = len(acts_q)
    Lp = len(acts_p)
    qwz_layers = [(next(it), next(it)) for _ in range(Lq)]
    qy_w_ref = next(it)
    qy_z_ref = next(it)
    qy_x_ref = next(it)
    qy_s0_ref = next(it)
    qy_rest = [(next(it), next(it)) for _ in range(Lq - 1)]
    px_layers = [(next(it), next(it)) for _ in range(Lp)]
    pz_layers = [(next(it), next(it)) for _ in range(Lp)]
    wz_out = next(it)
    w_out = next(it)
    z_out = next(it)
    qy_out = next(it)
    rec_out = next(it)
    zw_out = next(it)
    lp_out = next(it)

    def dense(h, w_ref, s_ref, act):
        # bf16 operands -> native MXU rate; accumulate/affine/LeakyReLU in f32.
        h = jnp.dot(h.astype(jnp.bfloat16), w_ref[...],
                    preferred_element_type=jnp.float32)
        h = h + s_ref[...]                        # Linear bias + BN fold
        if act:                                    # static trace-time branch
            h = jnp.maximum(h, 0.01 * h)           # LeakyReLU(0.01)
        return h

    # ---- Qwz ----
    x = x_ref[...]
    h = x
    for (w_r, s_r), a in zip(qwz_layers, acts_q):
        h = dense(h, w_r, s_r, a)
    # lane-aligned layout: [mu_w | logvar_w | mu_z | logvar_z]
    mu_w = h[:, 0:wgp]
    lv_w = h[:, wgp:2 * wgp]
    mu_z = h[:, 2 * wgp:2 * wgp + zgp]
    lv_z = h[:, 2 * wgp + zgp:2 * wgp + 2 * zgp]
    w = mu_w + noise_w_ref[...] * jnp.exp(0.5 * lv_w)     # reparameterization
    z = mu_z + noise_z_ref[...] * jnp.exp(0.5 * lv_z)
    wz_out[...] = h
    w_out[...] = w
    z_out[...] = z

    # ---- Qy (concat-free first layer: w@W_w + z@W_z + x@W_x) ----
    hq = (jnp.dot(w.astype(jnp.bfloat16), qy_w_ref[...],
                  preferred_element_type=jnp.float32)
          + jnp.dot(z.astype(jnp.bfloat16), qy_z_ref[...],
                    preferred_element_type=jnp.float32)
          + jnp.dot(x.astype(jnp.bfloat16), qy_x_ref[...],
                    preferred_element_type=jnp.float32)
          + qy_s0_ref[...])
    if acts_q[0]:
        hq = jnp.maximum(hq, 0.01 * hq)
    for (w_r, s_r), a in zip(qy_rest, acts_q[1:]):
        hq = dense(hq, w_r, s_r, a)
    # masked softmax over the real class lanes (padded lanes -> -inf / 0)
    lane = lax.broadcasted_iota(jnp.int32, hq.shape, 1)
    cmask = lane < nclasses
    logits = jnp.where(cmask, hq, -1e30)
    m = jnp.max(logits, axis=-1, keepdims=True)
    p = jnp.exp(logits - m)
    s = jnp.sum(p, axis=-1, keepdims=True)
    qy = p / s
    eps = 1e-8
    qy = eps / nclasses + (1.0 - eps) * qy
    qy_out[...] = jnp.where(cmask, qy, 0.0)

    # ---- Px (reconstruction) + Gaussian log-prob row sums ----
    hp = z
    for (w_r, s_r), a in zip(px_layers, acts_p):
        hp = dense(hp, w_r, s_r, a)
    rec_out[...] = hp
    ls = logsig_ref[...]                      # (1, nx_pad) clipped logsigma_x
    diff = (x - hp) * jnp.exp(-ls)
    lp = -0.5 * diff * diff - ls - 0.5 * math.log(2.0 * math.pi)
    lanex = lax.broadcasted_iota(jnp.int32, lp.shape, 1)
    lp = jnp.where(lanex < nx, lp, 0.0)       # mask padded feature lanes
    lp_out[...] = jnp.sum(lp, axis=-1, keepdims=True)

    # ---- Pz ----
    hz = w
    for (w_r, s_r), a in zip(pz_layers, acts_p):
        hz = dense(hz, w_r, s_r, a)
    zw_out[...] = hz


# ----------------------------------------------------------------------------
# Parameter construction (deterministic, PyTorch-default Linear init).
# buildNetworkv5 hidden layer = [Dropout, Linear, BatchNorm1d, LeakyReLU];
# final layer = Linear.  Dropout == identity at eval time.  BN (running
# mean=0, var=1, gamma=1, beta=0) is folded into W / bias HERE, once.
# All padding / splitting / bf16 casting happens outside the jitted forward.
# ----------------------------------------------------------------------------
def _init_linear(key, fan_in, fan_out):
    k1, k2 = jax.random.split(key)
    bound = 1.0 / float(fan_in) ** 0.5
    W = jax.random.uniform(k1, (fan_in, fan_out), jnp.float32, -bound, bound)
    b = jax.random.uniform(k2, (fan_out,), jnp.float32, -bound, bound)
    return W, b


def _make_dense_chain(key, dims, batchnorm=True):
    layers = []
    L = len(dims) - 1
    for i in range(L):
        key, sub = jax.random.split(key)
        W, b = _init_linear(sub, dims[i], dims[i + 1])
        if i < L - 1 and batchnorm:
            scale = 1.0 / math.sqrt(1.0 + 1e-5)   # eval BN: mean=0, var=1
            W = W * scale                         # fold BN scale into weight
            b = b * scale                         # fold bias through BN
        layers.append((W, b))
    return layers, key


def _pad_layer(W, b):
    Kp = _round_up(W.shape[0], 128)
    Np = _round_up(W.shape[1], 128)
    return (_pad2(W, Kp, Np).astype(jnp.bfloat16),
            _pad_axis(b[None, :], Np, 1).astype(jnp.float32))


def init_params(key, nx, nhq, nhp, nz, nw, nclasses, numhiddenq, numhiddenp,
                batchnorm=True):
    wgp = _round_up(nw, 128)
    zgp = _round_up(nz, 128)
    nx_pad = _round_up(nx, 128)
    params = {}

    # ---- Qwz: [nx] + numhiddenq*[nhq] + [2*(nw+nz)] ----
    layers, key = _make_dense_chain(
        key, [nx] + numhiddenq * [nhq] + [2 * (nw + nz)], batchnorm)
    qwz = [_pad_layer(W, b) for (W, b) in layers[:-1]]
    W, b = layers[-1]
    K = W.shape[0]
    Kp = _round_up(K, 128)
    N_al = 2 * wgp + 2 * zgp
    # Permute final-layer columns into lane-aligned [mu_w|lv_w|mu_z|lv_z]
    # groups (original flattened (2, nw+nz) layout: mu_w, mu_z, lv_w, lv_z).
    Wp = jnp.zeros((Kp, N_al), jnp.float32)
    bp = jnp.zeros((1, N_al), jnp.float32)
    Wp = Wp.at[:K, 0:nw].set(W[:, 0:nw])                              # mu_w
    Wp = Wp.at[:K, wgp:wgp + nw].set(W[:, nw + nz:2 * nw + nz])       # lv_w
    Wp = Wp.at[:K, 2 * wgp:2 * wgp + nz].set(W[:, nw:nw + nz])        # mu_z
    Wp = Wp.at[:K, 2 * wgp + zgp:2 * wgp + zgp + nz].set(W[:, 2 * nw + nz:])
    bp = bp.at[0, 0:nw].set(b[0:nw])
    bp = bp.at[0, wgp:wgp + nw].set(b[nw + nz:2 * nw + nz])
    bp = bp.at[0, 2 * wgp:2 * wgp + nz].set(b[nw:nw + nz])
    bp = bp.at[0, 2 * wgp + zgp:2 * wgp + zgp + nz].set(b[2 * nw + nz:])
    qwz.append((Wp.astype(jnp.bfloat16), bp))
    params["qwz"] = qwz

    # ---- Qy: [nw+nz+nx] + numhiddenq*[nhq] + [nclasses]; split 1st layer ----
    layers, key = _make_dense_chain(
        key, [nx + nw + nz] + numhiddenq * [nhq] + [nclasses], batchnorm)
    W0, b0 = layers[0]
    Np0 = _round_up(W0.shape[1], 128)
    params["qy_first"] = (
        _pad2(W0[0:nw], wgp, Np0).astype(jnp.bfloat16),           # w rows
        _pad2(W0[nw:nw + nz], zgp, Np0).astype(jnp.bfloat16),     # z rows
        _pad2(W0[nw + nz:], nx_pad, Np0).astype(jnp.bfloat16),    # x rows
        _pad_axis(b0[None, :], Np0, 1).astype(jnp.float32),
    )
    params["qy_rest"] = [_pad_layer(W, b) for (W, b) in layers[1:]]

    # ---- Px: [nz] + numhiddenp*[nhp] + [nx] ----
    layers, key = _make_dense_chain(
        key, [nz] + numhiddenp * [nhp] + [nx], batchnorm)
    params["px"] = [_pad_layer(W, b) for (W, b) in layers]

    # ---- Pz: [nw] + numhiddenp*[nhp] + [2*nclasses*nz] ----
    layers, key = _make_dense_chain(
        key, [nw] + numhiddenp * [nhp] + [2 * nclasses * nz], batchnorm)
    params["pz"] = [_pad_layer(W, b) for (W, b) in layers]

    params["logsigma_x"] = jnp.zeros((nx,), jnp.float32)
    # Dy / Dw / Dz / Qd networks are defined in __init__ but never used in
    # forward(); omitted here.
    return params


# ----------------------------------------------------------------------------
# Forward pass (eval-mode semantics of AAE_GMM_Type1107.forward, y=None,
# reclosstype='Gauss', relax=False).
# ----------------------------------------------------------------------------
def softclip(t, lo=-8.0, hi=8.0):
    r = lo + jax.nn.softplus(t - lo)
    r = hi - jax.nn.softplus(hi - r)
    return r


def make_forward(nx, nz, nw, nclasses, numhiddenq, numhiddenp,
                 zscale=1.0, wscale=1.0):
    acts_q = (True,) * numhiddenq + (False,)     # static Python metadata
    acts_p = (True,) * numhiddenp + (False,)
    wgp = _round_up(nw, 128)
    zgp = _round_up(nz, 128)
    nx_pad = _round_up(nx, 128)
    ncls_pad = _round_up(nclasses, 128)
    zw_pad = _round_up(2 * nclasses * nz, 128)
    wz_w = 2 * wgp + 2 * zgp

    kernel = functools.partial(
        _aae_forward_kernel, nw=nw, nz=nz, nclasses=nclasses, nx=nx,
        wgp=wgp, zgp=zgp, acts_q=acts_q, acts_p=acts_p)

    def forward(x_img, params, noise_w, noise_z):
        B = x_img.shape[0]
        x = x_img.reshape(B, -1)                          # nn.Flatten()

        # M tiling: one grid step at tiny batch; 128-row "parallel" tiles
        # (v7x megacore-friendly) once the batch grows.
        tm = min(_round_up(B, 8), 128)
        Mp = _round_up(B, tm)
        xp = _pad2(x, Mp, nx_pad)
        nwp = _pad2(noise_w, Mp, wgp)
        nzp = _pad2(noise_z, Mp, zgp)
        logsig_c = softclip(params["logsigma_x"], -8.0, 8.0)
        lsp = _pad_axis(logsig_c[None, :], nx_pad, 1)

        def row_spec(width):
            return pl.BlockSpec((tm, width), lambda i: (i, 0))

        operands = [xp, nwp, nzp, lsp]
        in_specs = [row_spec(nx_pad), row_spec(wgp), row_spec(zgp),
                    pl.BlockSpec(lsp.shape, lambda i: (0, 0))]

        def add_const(a):
            # Loop-invariant weight/shift: constant block index -> DMA'd once.
            # TODO(synk): if the model grows near v7x's 64 MiB VMEM, set
            # pipeline_mode=pl.Buffered(1) on these specs to drop the double
            # buffer and/or raise vmem_limit_bytes.
            operands.append(a)
            in_specs.append(pl.BlockSpec(a.shape, lambda i: (0, 0)))

        for (W, s) in params["qwz"]:
            add_const(W); add_const(s)
        for a in params["qy_first"]:
            add_const(a)
        for (W, s) in params["qy_rest"]:
            add_const(W); add_const(s)
        for (W, s) in params["px"]:
            add_const(W); add_const(s)
        for (W, s) in params["pz"]:
            add_const(W); add_const(s)

        out_shape = (
            jax.ShapeDtypeStruct((Mp, wz_w), jnp.float32),      # wz (aligned)
            jax.ShapeDtypeStruct((Mp, wgp), jnp.float32),       # w
            jax.ShapeDtypeStruct((Mp, zgp), jnp.float32),       # z
            jax.ShapeDtypeStruct((Mp, ncls_pad), jnp.float32),  # q_y
            jax.ShapeDtypeStruct((Mp, nx_pad), jnp.float32),    # rec
            jax.ShapeDtypeStruct((Mp, zw_pad), jnp.float32),    # Pz output
            jax.ShapeDtypeStruct((Mp, 1), jnp.float32),         # log-prob sums
        )
        out_specs = (
            row_spec(wz_w), row_spec(wgp), row_spec(zgp), row_spec(ncls_pad),
            row_spec(nx_pad), row_spec(zw_pad),
            pl.BlockSpec((tm, 1), lambda i: (i, 0)),
        )

        # Advisory cost hint for the XLA scheduler.
        flops = 0
        bytes_accessed = 0
        for a in operands:
            bytes_accessed += int(a.size) * a.dtype.itemsize
            if a.ndim == 2 and a.dtype == jnp.bfloat16:
                flops += 2 * Mp * a.shape[0] * a.shape[1]
        for sd in out_shape:
            bytes_accessed += int(math.prod(sd.shape)) * 4
        transcendentals = Mp * (wgp + zgp + ncls_pad + 2 * nx_pad)

        (wz_al, w_o, z_o, qy_o, rec_o, zw_o, lp_o) = pl.pallas_call(
            kernel,
            out_shape=out_shape,
            grid=(Mp // tm,),
            in_specs=in_specs,
            out_specs=out_specs,
            compiler_params=pltpu.CompilerParams(
                dimension_semantics=("parallel",)),
            cost_estimate=pl.CostEstimate(
                flops=int(flops),
                transcendentals=int(transcendentals),
                bytes_accessed=int(bytes_accessed)),
        )(*operands)

        # ------- glue on the (sliced-to-real) kernel outputs -------
        mu_w = wz_al[:B, 0:nw]
        logvar_w = wz_al[:B, wgp:wgp + nw]
        mu_z = wz_al[:B, 2 * wgp:2 * wgp + nz]
        logvar_z = wz_al[:B, 2 * wgp + zgp:2 * wgp + zgp + nz]
        std_w = jnp.exp(0.5 * logvar_w)
        std_z = jnp.exp(0.5 * logvar_z)
        w = w_o[:B, :nw]
        z = z_o[:B, :nz]
        wz = jnp.stack([jnp.concatenate([mu_w, mu_z], axis=1),
                        jnp.concatenate([logvar_w, logvar_z], axis=1)], axis=1)
        q_y = qy_o[:B, :nclasses]
        rec = rec_o[:B, :nx]
        loss_rec = -lp_o[:B, 0].mean()

        z_w = zw_o[:B, :2 * nclasses * nz].reshape(B, nclasses, 2 * nz)
        mu_z_w = z_w[:, :, :nz]
        logvar_z_w = z_w[:, :, nz:]
        std_z_w = jnp.exp(0.5 * logvar_z_w)

        # kld2normal(mu, logvar, mu2, logvar2)
        kld = 0.5 * (-1.0
                     + (jnp.exp(logvar_z[:, None, :])
                        + (mu_z[:, None, :] - mu_z_w) ** 2) / jnp.exp(logvar_z_w)
                     + logvar_z_w - logvar_z[:, None, :])
        loss_z = (q_y * (zscale * kld.sum(-1))).sum(-1).mean()
        loss_w = wscale * (
            -0.5 * (1.0 + logvar_w - mu_w ** 2 - jnp.exp(logvar_w))
        ).sum(-1).mean()
        loss_certainty = -1.0 * jnp.max(q_y, axis=-1).mean()
        total_loss = loss_rec                              # matches reference
        num_clusters = (jnp.where(q_y > 0.5, q_y, 0.0).sum(0) > 0).sum()

        losses = dict(rec=loss_rec, loss_z=loss_z, loss_w=loss_w,
                      loss_certainty=loss_certainty, total_loss=total_loss,
                      num_clusters=num_clusters)
        # TODO(synk): torch.distributions objects (Qw, Qz, Pz, Qy, priors) have
        # no Pallas/JAX-array equivalent; their (loc, scale) tensors are
        # returned instead.
        output = dict(wz=wz, mu_z=mu_z, mu_w=mu_w, logvar_z=logvar_z,
                      logvar_w=logvar_w, w=w, z=z, q_y=q_y, rec=rec,
                      Qw_loc=mu_w, Qw_scale=std_w,
                      Qz_loc=mu_z, Qz_scale=std_z,
                      Pz_loc=mu_z_w, Pz_scale=std_z_w,
                      losses=losses)
        return output

    return forward


# ----------------------------------------------------------------------------
if __name__ == "__main__":
    # Small config consistent with the module's forward:
    B, C, H, Wd = 2, 1, 16, 16
    nx = C * H * Wd                      # 256
    nhq = nhp = 128
    nz, nw, nclasses = 32, 16, 10
    numhiddenq = numhiddenp = 2

    key = jax.random.PRNGKey(0)
    key, kx, knw, knz, kp = jax.random.split(key, 5)
    x_img = jax.random.normal(kx, (B, C, H, Wd), jnp.float32)
    noise_w = jax.random.normal(knw, (B, nw), jnp.float32)   # randn_like(mu_w)
    noise_z = jax.random.normal(knz, (B, nz), jnp.float32)   # randn_like(mu_z)
    params = init_params(kp, nx, nhq, nhp, nz, nw, nclasses,
                         numhiddenq, numhiddenp)

    fwd = jax.jit(make_forward(nx, nz, nw, nclasses, numhiddenq, numhiddenp))
    out = fwd(x_img, params, noise_w, noise_z)
    jax.block_until_ready(out)

    # light sanity checks on shapes / finiteness
    assert out["rec"].shape == (B, nx)
    assert out["q_y"].shape == (B, nclasses)
    assert out["wz"].shape == (B, 2, nw + nz)
    assert out["Pz_loc"].shape == (B, nclasses, nz)
    assert bool(jnp.isfinite(out["losses"]["total_loss"]))
    assert bool(jnp.isfinite(out["losses"]["loss_z"]))
    assert bool(jnp.abs(out["q_y"].sum(-1) - 1.0).max() < 1e-3)
    print("KERNEL_OK")
</pallas_src>

<mosaic_0001>
module attributes {stable_mosaic.version = 11 : i64} {
  func.func @_aae_forward_kernel(%arg0: i32, %arg1: memref<8x256xf32, #tpu.memory_space<vmem>>, %arg2: memref<8x128xf32, #tpu.memory_space<vmem>>, %arg3: memref<8x128xf32, #tpu.memory_space<vmem>>, %arg4: memref<1x256xf32, #tpu.memory_space<vmem>>, %arg5: memref<256x128xbf16, #tpu.memory_space<vmem>>, %arg6: memref<1x128xf32, #tpu.memory_space<vmem>>, %arg7: memref<128x128xbf16, #tpu.memory_space<vmem>>, %arg8: memref<1x128xf32, #tpu.memory_space<vmem>>, %arg9: memref<128x512xbf16, #tpu.memory_space<vmem>>, %arg10: memref<1x512xf32, #tpu.memory_space<vmem>>, %arg11: memref<128x128xbf16, #tpu.memory_space<vmem>>, %arg12: memref<128x128xbf16, #tpu.memory_space<vmem>>, %arg13: memref<256x128xbf16, #tpu.memory_space<vmem>>, %arg14: memref<1x128xf32, #tpu.memory_space<vmem>>, %arg15: memref<128x128xbf16, #tpu.memory_space<vmem>>, %arg16: memref<1x128xf32, #tpu.memory_space<vmem>>, %arg17: memref<128x128xbf16, #tpu.memory_space<vmem>>, %arg18: memref<1x128xf32, #tpu.memory_space<vmem>>, %arg19: memref<128x128xbf16, #tpu.memory_space<vmem>>, %arg20: memref<1x128xf32, #tpu.memory_space<vmem>>, %arg21: memref<128x128xbf16, #tpu.memory_space<vmem>>, %arg22: memref<1x128xf32, #tpu.memory_space<vmem>>, %arg23: memref<128x256xbf16, #tpu.memory_space<vmem>>, %arg24: memref<1x256xf32, #tpu.memory_space<vmem>>, %arg25: memref<128x128xbf16, #tpu.memory_space<vmem>>, %arg26: memref<1x128xf32, #tpu.memory_space<vmem>>, %arg27: memref<128x128xbf16, #tpu.memory_space<vmem>>, %arg28: memref<1x128xf32, #tpu.memory_space<vmem>>, %arg29: memref<128x640xbf16, #tpu.memory_space<vmem>>, %arg30: memref<1x640xf32, #tpu.memory_space<vmem>>, %arg31: memref<8x512xf32, #tpu.memory_space<vmem>>, %arg32: memref<8x128xf32, #tpu.memory_space<vmem>>, %arg33: memref<8x128xf32, #tpu.memory_space<vmem>>, %arg34: memref<8x128xf32, #tpu.memory_space<vmem>>, %arg35: memref<8x256xf32, #tpu.memory_space<vmem>>, %arg36: memref<8x640xf32, #tpu.memory_space<vmem>>, %arg37: memref<8x1xf32, #tpu.memory_space<vmem>>) attributes {dimension_semantics = [#tpu.dimension_semantics<parallel>], iteration_bounds = array<i64: 1>, scalar_prefetch = 0 : i64, scratch_operands = 0 : i64, tpu.core_type = #tpu.core_type<tc>, window_params = [{transform_indices = @transform_0, window_bounds = array<i64: 8, 256>}, {transform_indices = @transform_1, window_bounds = array<i64: 8, 128>}, {transform_indices = @transform_2, window_bounds = array<i64: 8, 128>}, {pipeline_mode = #tpu.pipeline_mode<synchronous>, transform_indices = @transform_3, window_bounds = array<i64: 1, 256>}, {pipeline_mode = #tpu.pipeline_mode<synchronous>, transform_indices = @transform_4, window_bounds = array<i64: 256, 128>}, {pipeline_mode = #tpu.pipeline_mode<synchronous>, transform_indices = @transform_5, window_bounds = array<i64: 1, 128>}, {pipeline_mode = #tpu.pipeline_mode<synchronous>, transform_indices = @transform_6, window_bounds = array<i64: 128, 128>}, {pipeline_mode = #tpu.pipeline_mode<synchronous>, transform_indices = @transform_7, window_bounds = array<i64: 1, 128>}, {pipeline_mode = #tpu.pipeline_mode<synchronous>, transform_indices = @transform_8, window_bounds = array<i64: 128, 512>}, {pipeline_mode = #tpu.pipeline_mode<synchronous>, transform_indices = @transform_9, window_bounds = array<i64: 1, 512>}, {pipeline_mode = #tpu.pipeline_mode<synchronous>, transform_indices = @transform_10, window_bounds = array<i64: 128, 128>}, {pipeline_mode = #tpu.pipeline_mode<synchronous>, transform_indices = @transform_11, window_bounds = array<i64: 128, 128>}, {pipeline_mode = #tpu.pipeline_mode<synchronous>, transform_indices = @transform_12, window_bounds = array<i64: 256, 128>}, {pipeline_mode = #tpu.pipeline_mode<synchronous>, transform_indices = @transform_13, window_bounds = array<i64: 1, 128>}, {pipeline_mode = #tpu.pipeline_mode<synchronous>, transform_indices = @transform_14, window_bounds = array<i64: 128, 128>}, {pipeline_mode = #tpu.pipeline_mode<synchronous>, transform_indices = @transform_15, window_bounds = array<i64: 1, 128>}, {pipeline_mode = #tpu.pipeline_mode<synchronous>, transform_indices = @transform_16, window_bounds = array<i64: 128, 128>}, {pipeline_mode = #tpu.pipeline_mode<synchronous>, transform_indices = @transform_17, window_bounds = array<i64: 1, 128>}, {pipeline_mode = #tpu.pipeline_mode<synchronous>, transform_indices = @transform_18, window_bounds = array<i64: 128, 128>}, {pipeline_mode = #tpu.pipeline_mode<synchronous>, transform_indices = @transform_19, window_bounds = array<i64: 1, 128>}, {pipeline_mode = #tpu.pipeline_mode<synchronous>, transform_indices = @transform_20, window_bounds = array<i64: 128, 128>}, {pipeline_mode = #tpu.pipeline_mode<synchronous>, transform_indices = @transform_21, window_bounds = array<i64: 1, 128>}, {pipeline_mode = #tpu.pipeline_mode<synchronous>, transform_indices = @transform_22, window_bounds = array<i64: 128, 256>}, {pipeline_mode = #tpu.pipeline_mode<synchronous>, transform_indices = @transform_23, window_bounds = array<i64: 1, 256>}, {pipeline_mode = #tpu.pipeline_mode<synchronous>, transform_indices = @transform_24, window_bounds = array<i64: 128, 128>}, {pipeline_mode = #tpu.pipeline_mode<synchronous>, transform_indices = @transform_25, window_bounds = array<i64: 1, 128>}, {pipeline_mode = #tpu.pipeline_mode<synchronous>, transform_indices = @transform_26, window_bounds = array<i64: 128, 128>}, {pipeline_mode = #tpu.pipeline_mode<synchronous>, transform_indices = @transform_27, window_bounds = array<i64: 1, 128>}, {pipeline_mode = #tpu.pipeline_mode<synchronous>, transform_indices = @transform_28, window_bounds = array<i64: 128, 640>}, {pipeline_mode = #tpu.pipeline_mode<synchronous>, transform_indices = @transform_29, window_bounds = array<i64: 1, 640>}, {transform_indices = @transform_30, window_bounds = array<i64: 8, 512>}, {transform_indices = @transform_31, window_bounds = array<i64: 8, 128>}, {transform_indices = @transform_32, window_bounds = array<i64: 8, 128>}, {transform_indices = @transform_33, window_bounds = array<i64: 8, 128>}, {transform_indices = @transform_34, window_bounds = array<i64: 8, 256>}, {transform_indices = @transform_35, window_bounds = array<i64: 8, 640>}, {transform_indices = @transform_36, window_bounds = array<i64: 8, 1>}]} {
    %c0 = arith.constant 0 : index
    %c0_0 = arith.constant 0 : index
    %0 = vector.load %arg1[%c0, %c0_0] : memref<8x256xf32, #tpu.memory_space<vmem>>, vector<8x256xf32>
    %1 = arith.truncf %0 : vector<8x256xf32> to vector<8x256xbf16>
    %c0_1 = arith.constant 0 : index
    %c0_2 = arith.constant 0 : index
    %2 = vector.load %arg5[%c0_1, %c0_2] : memref<256x128xbf16, #tpu.memory_space<vmem>>, vector<256x128xbf16>
    %cst = arith.constant dense<0.000000e+00> : vector<8x128xf32>
    %3 = tpu.matmul %1, %2, %cst {dimension_numbers = #tpu.dot_dimension_numbers<[1], [0], [0], [1], [0, 0, 1, 1], [], []>} : vector<8x256xbf16>, vector<256x128xbf16>, vector<8x128xf32> -> vector<8x128xf32>
    %c0_3 = arith.constant 0 : index
    %c0_4 = arith.constant 0 : index
    %4 = vector.load %arg6[%c0_3, %c0_4] : memref<1x128xf32, #tpu.memory_space<vmem>>, vector<1x128xf32>
    %5 = vector.broadcast %4 : vector<1x128xf32> to vector<8x128xf32>
    %6 = arith.addf %3, %5 : vector<8x128xf32>
    %cst_5 = arith.constant 0.00999999977 : f32
    %7 = vector.broadcast %cst_5 : f32 to vector<8x128xf32>
    %8 = arith.mulf %7, %6 : vector<8x128xf32>
    %9 = arith.maximumf %6, %8 : vector<8x128xf32>
    %10 = arith.truncf %9 : vector<8x128xf32> to vector<8x128xbf16>
    %c0_6 = arith.constant 0 : index
    %c0_7 = arith.constant 0 : index
    %11 = vector.load %arg7[%c0_6, %c0_7] : memref<128x128xbf16, #tpu.memory_space<vmem>>, vector<128x128xbf16>
    %cst_8 = arith.constant dense<0.000000e+00> : vector<8x128xf32>
    %12 = tpu.matmul %10, %11, %cst_8 {dimension_numbers = #tpu.dot_dimension_numbers<[1], [0], [0], [1], [0, 0, 1, 1], [], []>} : vector<8x128xbf16>, vector<128x128xbf16>, vector<8x128xf32> -> vector<8x128xf32>
    %c0_9 = arith.constant 0 : index
    %c0_10 = arith.constant 0 : index
    %13 = vector.load %arg8[%c0_9, %c0_10] : memref<1x128xf32, #tpu.memory_space<vmem>>, vector<1x128xf32>
    %14 = vector.broadcast %13 : vector<1x128xf32> to vector<8x128xf32>
    %15 = arith.addf %12, %14 : vector<8x128xf32>
    %cst_11 = arith.constant 0.00999999977 : f32
    %16 = vector.broadcast %cst_11 : f32 to vector<8x128xf32>
    %17 = arith.mulf %16, %15 : vector<8x128xf32>
    %18 = arith.maximumf %15, %17 : vector<8x128xf32>
    %19 = arith.truncf %18 : vector<8x128xf32> to vector<8x128xbf16>
    %c0_12 = arith.constant 0 : index
    %c0_13 = arith.constant 0 : index
    %20 = vector.load %arg9[%c0_12, %c0_13] : memref<128x512xbf16, #tpu.memory_space<vmem>>, vector<128x512xbf16>
    %cst_14 = arith.constant dense<0.000000e+00> : vector<8x512xf32>
    %21 = tpu.matmul %19, %20, %cst_14 {dimension_numbers = #tpu.dot_dimension_numbers<[1], [0], [0], [1], [0, 0, 1, 1], [], []>} : vector<8x128xbf16>, vector<128x512xbf16>, vector<8x512xf32> -> vector<8x512xf32>
    %c0_15 = arith.constant 0 : index
    %c0_16 = arith.constant 0 : index
    %22 = vector.load %arg10[%c0_15, %c0_16] : memref<1x512xf32, #tpu.memory_space<vmem>>, vector<1x512xf32>
    %23 = vector.broadcast %22 : vector<1x512xf32> to vector<8x512xf32>
    %24 = arith.addf %21, %23 : vector<8x512xf32>
    %25 = vector.extract_strided_slice %24 {offsets = [0, 0], sizes = [8, 128], strides = [1, 1]} : vector<8x512xf32> to vector<8x128xf32>
    %26 = vector.extract_strided_slice %24 {offsets = [0, 128], sizes = [8, 128], strides = [1, 1]} : vector<8x512xf32> to vector<8x128xf32>
    %27 = vector.extract_strided_slice %24 {offsets = [0, 256], sizes = [8, 128], strides = [1, 1]} : vector<8x512xf32> to vector<8x128xf32>
    %28 = vector.extract_strided_slice %24 {offsets = [0, 384], sizes = [8, 128], strides = [1, 1]} : vector<8x512xf32> to vector<8x128xf32>
    %c0_17 = arith.constant 0 : index
    %c0_18 = arith.constant 0 : index
    %29 = vector.load %arg2[%c0_17, %c0_18] : memref<8x128xf32, #tpu.memory_space<vmem>>, vector<8x128xf32>
    %cst_19 = arith.constant 5.000000e-01 : f32
    %30 = vector.broadcast %cst_19 : f32 to vector<8x128xf32>
    %31 = arith.mulf %30, %26 : vector<8x128xf32>
    %32 = math.exp %31 : vector<8x128xf32>
    %33 = arith.mulf %29, %32 : vector<8x128xf32>
    %34 = arith.addf %25, %33 : vector<8x128xf32>
    %c0_20 = arith.constant 0 : index
    %c0_21 = arith.constant 0 : index
    %35 = vector.load %arg3[%c0_20, %c0_21] : memref<8x128xf32, #tpu.memory_space<vmem>>, vector<8x128xf32>
    %cst_22 = arith.constant 5.000000e-01 : f32
    %36 = vector.broadcast %cst_22 : f32 to vector<8x128xf32>
    %37 = arith.mulf %36, %28 : vector<8x128xf32>
    %38 = math.exp %37 : vector<8x128xf32>
    %39 = arith.mulf %35, %38 : vector<8x128xf32>
    %40 = arith.addf %27, %39 : vector<8x128xf32>
    %c0_23 = arith.constant 0 : index
    %c0_24 = arith.constant 0 : index
    %41 = vector.load %arg31[%c0_23, %c0_24] : memref<8x512xf32, #tpu.memory_space<vmem>>, vector<8x512xf32>
    tpu.vector_store %arg31[%c0_23, %c0_24], %24 {strides = array<i32>} : memref<8x512xf32, #tpu.memory_space<vmem>>, vector<8x512xf32>,
    %c0_25 = arith.constant 0 : index
    %c0_26 = arith.constant 0 : index
    %42 = vector.load %arg32[%c0_25, %c0_26] : memref<8x128xf32, #tpu.memory_space<vmem>>, vector<8x128xf32>
    tpu.vector_store %arg32[%c0_25, %c0_26], %34 {strides = array<i32>} : memref<8x128xf32, #tpu.memory_space<vmem>>, vector<8x128xf32>,
    %c0_27 = arith.constant 0 : index
    %c0_28 = arith.constant 0 : index
    %43 = vector.load %arg33[%c0_27, %c0_28] : memref<8x128xf32, #tpu.memory_space<vmem>>, vector<8x128xf32>
    tpu.vector_store %arg33[%c0_27, %c0_28], %40 {strides = array<i32>} : memref<8x128xf32, #tpu.memory_space<vmem>>, vector<8x128xf32>,
    %44 = arith.truncf %34 : vector<8x128xf32> to vector<8x128xbf16>
    %c0_29 = arith.constant 0 : index
    %c0_30 = arith.constant 0 : index
    %45 = vector.load %arg11[%c0_29, %c0_30] : memref<128x128xbf16, #tpu.memory_space<vmem>>, vector<128x128xbf16>
    %cst_31 = arith.constant dense<0.000000e+00> : vector<8x128xf32>
    %46 = tpu.matmul %44, %45, %cst_31 {dimension_numbers = #tpu.dot_dimension_numbers<[1], [0], [0], [1], [0, 0, 1, 1], [], []>} : vector<8x128xbf16>, vector<128x128xbf16>, vector<8x128xf32> -> vector<8x128xf32>
    %47 = arith.truncf %40 : vector<8x128xf32> to vector<8x128xbf16>
    %c0_32 = arith.constant 0 : index
    %c0_33 = arith.constant 0 : index
    %48 = vector.load %arg12[%c0_32, %c0_33] : memref<128x128xbf16, #tpu.memory_space<vmem>>, vector<128x128xbf16>
    %cst_34 = arith.constant dense<0.000000e+00> : vector<8x128xf32>
    %49 = tpu.matmul %47, %48, %cst_34 {dimension_numbers = #tpu.dot_dimension_numbers<[1], [0], [0], [1], [0, 0, 1, 1], [], []>} : vector<8x128xbf16>, vector<128x128xbf16>, vector<8x128xf32> -> vector<8x128xf32>
    %50 = arith.addf %46, %49 : vector<8x128xf32>
    %51 = arith.truncf %0 : vector<8x256xf32> to vector<8x256xbf16>
    %c0_35 = arith.constant 0 : index
    %c0_36 = arith.constant 0 : index
    %52 = vector.load %arg13[%c0_35, %c0_36] : memref<256x128xbf16, #tpu.memory_space<vmem>>, vector<256x128xbf16>
    %cst_37 = arith.constant dense<0.000000e+00> : vector<8x128xf32>
    %53 = tpu.matmul %51, %52, %cst_37 {dimension_numbers = #tpu.dot_dimension_numbers<[1], [0], [0], [1], [0, 0, 1, 1], [], []>} : vector<8x256xbf16>, vector<256x128xbf16>, vector<8x128xf32> -> vector<8x128xf32>
    %54 = arith.addf %50, %53 : vector<8x128xf32>
    %c0_38 = arith.constant 0 : index
    %c0_39 = arith.constant 0 : index
    %55 = vector.load %arg14[%c0_38, %c0_39] : memref<1x128xf32, #tpu.memory_space<vmem>>, vector<1x128xf32>
    %56 = vector.broadcast %55 : vector<1x128xf32> to vector<8x128xf32>
    %57 = arith.addf %54, %56 : vector<8x128xf32>
    %cst_40 = arith.constant 0.00999999977 : f32
    %58 = vector.broadcast %cst_40 : f32 to vector<8x128xf32>
    %59 = arith.mulf %58, %57 : vector<8x128xf32>
    %60 = arith.maximumf %57, %59 : vector<8x128xf32>
    %61 = arith.truncf %60 : vector<8x128xf32> to vector<8x128xbf16>
    %c0_41 = arith.constant 0 : index
    %c0_42 = arith.constant 0 : index
    %62 = vector.load %arg15[%c0_41, %c0_42] : memref<128x128xbf16, #tpu.memory_space<vmem>>, vector<128x128xbf16>
    %cst_43 = arith.constant dense<0.000000e+00> : vector<8x128xf32>
    %63 = tpu.matmul %61, %62, %cst_43 {dimension_numbers = #tpu.dot_dimension_numbers<[1], [0], [0], [1], [0, 0, 1, 1], [], []>} : vector<8x128xbf16>, vector<128x128xbf16>, vector<8x128xf32> -> vector<8x128xf32>
    %c0_44 = arith.constant 0 : index
    %c0_45 = arith.constant 0 : index
    %64 = vector.load %arg16[%c0_44, %c0_45] : memref<1x128xf32, #tpu.memory_space<vmem>>, vector<1x128xf32>
    %65 = vector.broadcast %64 : vector<1x128xf32> to vector<8x128xf32>
    %66 = arith.addf %63, %65 : vector<8x128xf32>
    %cst_46 = arith.constant 0.00999999977 : f32
    %67 = vector.broadcast %cst_46 : f32 to vector<8x128xf32>
    %68 = arith.mulf %67, %66 : vector<8x128xf32>
    %69 = arith.maximumf %66, %68 : vector<8x128xf32>
    %70 = arith.truncf %69 : vector<8x128xf32> to vector<8x128xbf16>
    %c0_47 = arith.constant 0 : index
    %c0_48 = arith.constant 0 : index
    %71 = vector.load %arg17[%c0_47, %c0_48] : memref<128x128xbf16, #tpu.memory_space<vmem>>, vector<128x128xbf16>
    %cst_49 = arith.constant dense<0.000000e+00> : vector<8x128xf32>
    %72 = tpu.matmul %70, %71, %cst_49 {dimension_numbers = #tpu.dot_dimension_numbers<[1], [0], [0], [1], [0, 0, 1, 1], [], []>} : vector<8x128xbf16>, vector<128x128xbf16>, vector<8x128xf32> -> vector<8x128xf32>
    %c0_50 = arith.constant 0 : index
    %c0_51 = arith.constant 0 : index
    %73 = vector.load %arg18[%c0_50, %c0_51] : memref<1x128xf32, #tpu.memory_space<vmem>>, vector<1x128xf32>
    %74 = vector.broadcast %73 : vector<1x128xf32> to vector<8x128xf32>
    %75 = arith.addf %72, %74 : vector<8x128xf32>
    %76 = tpu.iota {dimensions = array<i32: 1>} : vector<8x128xi32>
    %c10_i32 = arith.constant 10 : i32
    %77 = vector.broadcast %c10_i32 : i32 to vector<8x128xi32>
    %78 = arith.cmpi slt, %76, %77 : vector<8x128xi32>
    %cst_52 = arith.constant -1.000000e+30 : f32
    %79 = vector.broadcast %cst_52 : f32 to vector<8x128xf32>
    %80 = arith.select %78, %75, %79 : vector<8x128xi1>, vector<8x128xf32>
    %cst_53 = arith.constant dense<0xFF800000> : vector<8xf32>
    %81 = vector.multi_reduction <maximumf>, %80, %cst_53 [1] : vector<8x128xf32> to vector<8xf32>
    %82 = vector.shape_cast %81 : vector<8xf32> to vector<8x1xf32>
    %83 = vector.broadcast %82 : vector<8x1xf32> to vector<8x128xf32>
    %84 = arith.subf %80, %83 : vector<8x128xf32>
    %85 = math.exp %84 : vector<8x128xf32>
    %cst_54 = arith.constant dense<0.000000e+00> : vector<8xf32>
    %86 = vector.multi_reduction <add>, %85, %cst_54 [1] : vector<8x128xf32> to vector<8xf32>
    %87 = vector.shape_cast %86 : vector<8xf32> to vector<8x1xf32>
    %88 = vector.broadcast %87 : vector<8x1xf32> to vector<8x128xf32>
    %89 = arith.divf %85, %88 : vector<8x128xf32>
    %cst_55 = arith.constant 1.000000e+00 : f32
    %90 = vector.broadcast %cst_55 : f32 to vector<8x128xf32>
    %91 = arith.mulf %90, %89 : vector<8x128xf32>
    %cst_56 = arith.constant 9.99999971E-10 : f32
    %92 = vector.broadcast %cst_56 : f32 to vector<8x128xf32>
    %93 = arith.addf %92, %91 : vector<8x128xf32>
    %cst_57 = arith.constant 0.000000e+00 : f32
    %94 = vector.broadcast %cst_57 : f32 to vector<8x128xf32>
    %95 = arith.select %78, %93, %94 : vector<8x128xi1>, vector<8x128xf32>
    %c0_58 = arith.constant 0 : index
    %c0_59 = arith.constant 0 : index
    %96 = vector.load %arg34[%c0_58, %c0_59] : memref<8x128xf32, #tpu.memory_space<vmem>>, vector<8x128xf32>
    tpu.vector_store %arg34[%c0_58, %c0_59], %95 {strides = array<i32>} : memref<8x128xf32, #tpu.memory_space<vmem>>, vector<8x128xf32>,
    %97 = arith.truncf %40 : vector<8x128xf32> to vector<8x128xbf16>
    %c0_60 = arith.constant 0 : index
    %c0_61 = arith.constant 0 : index
    %98 = vector.load %arg19[%c0_60, %c0_61] : memref<128x128xbf16, #tpu.memory_space<vmem>>, vector<128x128xbf16>
    %cst_62 = arith.constant dense<0.000000e+00> : vector<8x128xf32>
    %99 = tpu.matmul %97, %98, %cst_62 {dimension_numbers = #tpu.dot_dimension_numbers<[1], [0], [0], [1], [0, 0, 1, 1], [], []>} : vector<8x128xbf16>, vector<128x128xbf16>, vector<8x128xf32> -> vector<8x128xf32>
    %c0_63 = arith.constant 0 : index
    %c0_64 = arith.constant 0 : index
    %100 = vector.load %arg20[%c0_63, %c0_64] : memref<1x128xf32, #tpu.memory_space<vmem>>, vector<1x128xf32>
    %101 = vector.broadcast %100 : vector<1x128xf32> to vector<8x128xf32>
    %102 = arith.addf %99, %101 : vector<8x128xf32>
    %cst_65 = arith.constant 0.00999999977 : f32
    %103 = vector.broadcast %cst_65 : f32 to vector<8x128xf32>
    %104 = arith.mulf %103, %102 : vector<8x128xf32>
    %105 = arith.maximumf %102, %104 : vector<8x128xf32>
    %106 = arith.truncf %105 : vector<8x128xf32> to vector<8x128xbf16>
    %c0_66 = arith.constant 0 : index
    %c0_67 = arith.constant 0 : index
    %107 = vector.load %arg21[%c0_66, %c0_67] : memref<128x128xbf16, #tpu.memory_space<vmem>>, vector<128x128xbf16>
    %cst_68 = arith.constant dense<0.000000e+00> : vector<8x128xf32>
    %108 = tpu.matmul %106, %107, %cst_68 {dimension_numbers = #tpu.dot_dimension_numbers<[1], [0], [0], [1], [0, 0, 1, 1], [], []>} : vector<8x128xbf16>, vector<128x128xbf16>, vector<8x128xf32> -> vector<8x128xf32>
    %c0_69 = arith.constant 0 : index
    %c0_70 = arith.constant 0 : index
    %109 = vector.load %arg22[%c0_69, %c0_70] : memref<1x128xf32, #tpu.memory_space<vmem>>, vector<1x128xf32>
    %110 = vector.broadcast %109 : vector<1x128xf32> to vector<8x128xf32>
    %111 = arith.addf %108, %110 : vector<8x128xf32>
    %cst_71 = arith.constant 0.00999999977 : f32
    %112 = vector.broadcast %cst_71 : f32 to vector<8x128xf32>
    %113 = arith.mulf %112, %111 : vector<8x128xf32>
    %114 = arith.maximumf %111, %113 : vector<8x128xf32>
    %115 = arith.truncf %114 : vector<8x128xf32> to vector<8x128xbf16>
    %c0_72 = arith.constant 0 : index
    %c0_73 = arith.constant 0 : index
    %116 = vector.load %arg23[%c0_72, %c0_73] : memref<128x256xbf16, #tpu.memory_space<vmem>>, vector<128x256xbf16>
    %cst_74 = arith.constant dense<0.000000e+00> : vector<8x256xf32>
    %117 = tpu.matmul %115, %116, %cst_74 {dimension_numbers = #tpu.dot_dimension_numbers<[1], [0], [0], [1], [0, 0, 1, 1], [], []>} : vector<8x128xbf16>, vector<128x256xbf16>, vector<8x256xf32> -> vector<8x256xf32>
    %c0_75 = arith.constant 0 : index
    %c0_76 = arith.constant 0 : index
    %118 = vector.load %arg24[%c0_75, %c0_76] : memref<1x256xf32, #tpu.memory_space<vmem>>, vector<1x256xf32>
    %119 = vector.broadcast %118 : vector<1x256xf32> to vector<8x256xf32>
    %120 = arith.addf %117, %119 : vector<8x256xf32>
    %c0_77 = arith.constant 0 : index
    %c0_78 = arith.constant 0 : index
    %121 = vector.load %arg35[%c0_77, %c0_78] : memref<8x256xf32, #tpu.memory_space<vmem>>, vector<8x256xf32>
    tpu.vector_store %arg35[%c0_77, %c0_78], %120 {strides = array<i32>} : memref<8x256xf32, #tpu.memory_space<vmem>>, vector<8x256xf32>,
    %c0_79 = arith.constant 0 : index
    %c0_80 = arith.constant 0 : index
    %122 = vector.load %arg4[%c0_79, %c0_80] : memref<1x256xf32, #tpu.memory_space<vmem>>, vector<1x256xf32>
    %123 = arith.subf %0, %120 : vector<8x256xf32>
    %cst_81 = arith.constant 0.000000e+00 : f32
    %124 = vector.broadcast %cst_81 : f32 to vector<1x256xf32>
    %125 = arith.subf %124, %122 : vector<1x256xf32>
    %126 = math.exp %125 : vector<1x256xf32>
    %127 = vector.broadcast %126 : vector<1x256xf32> to vector<8x256xf32>
    %128 = arith.mulf %123, %127 : vector<8x256xf32>
    %cst_82 = arith.constant -5.000000e-01 : f32
    %129 = vector.broadcast %cst_82 : f32 to vector<8x256xf32>
    %130 = arith.mulf %129, %128 : vector<8x256xf32>
    %131 = arith.mulf %130, %128 : vector<8x256xf32>
    %132 = vector.broadcast %122 : vector<1x256xf32> to vector<8x256xf32>
    %133 = arith.subf %131, %132 : vector<8x256xf32>
    %cst_83 = arith.constant 0.918938517 : f32
    %134 = vector.broadcast %cst_83 : f32 to vector<8x256xf32>
    %135 = arith.subf %133, %134 : vector<8x256xf32>
    %136 = tpu.iota {dimensions = array<i32: 1>} : vector<8x256xi32>
    %c256_i32 = arith.constant 256 : i32
    %137 = vector.broadcast %c256_i32 : i32 to vector<8x256xi32>
    %138 = arith.cmpi slt, %136, %137 : vector<8x256xi32>
    %cst_84 = arith.constant 0.000000e+00 : f32
    %139 = vector.broadcast %cst_84 : f32 to vector<8x256xf32>
    %140 = arith.select %138, %135, %139 : vector<8x256xi1>, vector<8x256xf32>
    %cst_85 = arith.constant dense<0.000000e+00> : vector<8xf32>
    %141 = vector.multi_reduction <add>, %140, %cst_85 [1] : vector<8x256xf32> to vector<8xf32>
    %142 = vector.shape_cast %141 : vector<8xf32> to vector<8x1xf32>
    %c0_86 = arith.constant 0 : index
    %c0_87 = arith.constant 0 : index
    %143 = vector.load %arg37[%c0_86, %c0_87] : memref<8x1xf32, #tpu.memory_space<vmem>>, vector<8x1xf32>
    tpu.vector_store %arg37[%c0_86, %c0_87], %142 {strides = array<i32>} : memref<8x1xf32, #tpu.memory_space<vmem>>, vector<8x1xf32>,
    %144 = arith.truncf %34 : vector<8x128xf32> to vector<8x128xbf16>
    %c0_88 = arith.constant 0 : index
    %c0_89 = arith.constant 0 : index
    %145 = vector.load %arg25[%c0_88, %c0_89] : memref<128x128xbf16, #tpu.memory_space<vmem>>, vector<128x128xbf16>
    %cst_90 = arith.constant dense<0.000000e+00> : vector<8x128xf32>
    %146 = tpu.matmul %144, %145, %cst_90 {dimension_numbers = #tpu.dot_dimension_numbers<[1], [0], [0], [1], [0, 0, 1, 1], [], []>} : vector<8x128xbf16>, vector<128x128xbf16>, vector<8x128xf32> -> vector<8x128xf32>
    %c0_91 = arith.constant 0 : index
    %c0_92 = arith.constant 0 : index
    %147 = vector.load %arg26[%c0_91, %c0_92] : memref<1x128xf32, #tpu.memory_space<vmem>>, vector<1x128xf32>
    %148 = vector.broadcast %147 : vector<1x128xf32> to vector<8x128xf32>
    %149 = arith.addf %146, %148 : vector<8x128xf32>
    %cst_93 = arith.constant 0.00999999977 : f32
    %150 = vector.broadcast %cst_93 : f32 to vector<8x128xf32>
    %151 = arith.mulf %150, %149 : vector<8x128xf32>
    %152 = arith.maximumf %149, %151 : vector<8x128xf32>
    %153 = arith.truncf %152 : vector<8x128xf32> to vector<8x128xbf16>
    %c0_94 = arith.constant 0 : index
    %c0_95 = arith.constant 0 : index
    %154 = vector.load %arg27[%c0_94, %c0_95] : memref<128x128xbf16, #tpu.memory_space<vmem>>, vector<128x128xbf16>
    %cst_96 = arith.constant dense<0.000000e+00> : vector<8x128xf32>
    %155 = tpu.matmul %153, %154, %cst_96 {dimension_numbers = #tpu.dot_dimension_numbers<[1], [0], [0], [1], [0, 0, 1, 1], [], []>} : vector<8x128xbf16>, vector<128x128xbf16>, vector<8x128xf32> -> vector<8x128xf32>
    %c0_97 = arith.constant 0 : index
    %c0_98 = arith.constant 0 : index
    %156 = vector.load %arg28[%c0_97, %c0_98] : memref<1x128xf32, #tpu.memory_space<vmem>>, vector<1x128xf32>
    %157 = vector.broadcast %156 : vector<1x128xf32> to vector<8x128xf32>
    %158 = arith.addf %155, %157 : vector<8x128xf32>
    %cst_99 = arith.constant 0.00999999977 : f32
    %159 = vector.broadcast %cst_99 : f32 to vector<8x128xf32>
    %160 = arith.mulf %159, %158 : vector<8x128xf32>
    %161 = arith.maximumf %158, %160 : vector<8x128xf32>
    %162 = arith.truncf %161 : vector<8x128xf32> to vector<8x128xbf16>
    %c0_100 = arith.constant 0 : index
    %c0_101 = arith.constant 0 : index
    %163 = vector.load %arg29[%c0_100, %c0_101] : memref<128x640xbf16, #tpu.memory_space<vmem>>, vector<128x640xbf16>
    %cst_102 = arith.constant dense<0.000000e+00> : vector<8x640xf32>
    %164 = tpu.matmul %162, %163, %cst_102 {dimension_numbers = #tpu.dot_dimension_numbers<[1], [0], [0], [1], [0, 0, 1, 1], [], []>} : vector<8x128xbf16>, vector<128x640xbf16>, vector<8x640xf32> -> vector<8x640xf32>
    %c0_103 = arith.constant 0 : index
    %c0_104 = arith.constant 0 : index
    %165 = vector.load %arg30[%c0_103, %c0_104] : memref<1x640xf32, #tpu.memory_space<vmem>>, vector<1x640xf32>
    %166 = vector.broadcast %165 : vector<1x640xf32> to vector<8x640xf32>
    %167 = arith.addf %164, %166 : vector<8x640xf32>
    %c0_105 = arith.constant 0 : index
    %c0_106 = arith.constant 0 : index
    %168 = vector.load %arg36[%c0_105, %c0_106] : memref<8x640xf32, #tpu.memory_space<vmem>>, vector<8x640xf32>
    tpu.vector_store %arg36[%c0_105, %c0_106], %167 {strides = array<i32>} : memref<8x640xf32, #tpu.memory_space<vmem>>, vector<8x640xf32>,
    return
  }
  func.func @transform_0(%arg0: i32) -> (i32, i32) {
    %c0_i32 = arith.constant 0 : i32
    %c0_i32_0 = arith.constant 0 : i32
    return %arg0, %c0_i32 : i32, i32
  }
  func.func @transform_1(%arg0: i32) -> (i32, i32) {
    %c0_i32 = arith.constant 0 : i32
    %c0_i32_0 = arith.constant 0 : i32
    return %arg0, %c0_i32 : i32, i32
  }
  func.func @transform_2(%arg0: i32) -> (i32, i32) {
    %c0_i32 = arith.constant 0 : i32
    %c0_i32_0 = arith.constant 0 : i32
    return %arg0, %c0_i32 : i32, i32
  }
  func.func @transform_3(%arg0: i32) -> (i32, i32) {
    %c0_i32 = arith.constant 0 : i32
    %c0_i32_0 = arith.constant 0 : i32
    %c0_i32_1 = arith.constant 0 : i32
    return %c0_i32, %c0_i32_0 : i32, i32
  }
  func.func @transform_4(%arg0: i32) -> (i32, i32) {
    %c0_i32 = arith.constant 0 : i32
    %c0_i32_0 = arith.constant 0 : i32
    %c0_i32_1 = arith.constant 0 : i32
    return %c0_i32, %c0_i32_0 : i32, i32
  }
  func.func @transform_5(%arg0: i32) -> (i32, i32) {
    %c0_i32 = arith.constant 0 : i32
    %c0_i32_0 = arith.constant 0 : i32
    %c0_i32_1 = arith.constant 0 : i32
    return %c0_i32, %c0_i32_0 : i32, i32
  }
  func.func @transform_6(%arg0: i32) -> (i32, i32) {
    %c0_i32 = arith.constant 0 : i32
    %c0_i32_0 = arith.constant 0 : i32
    %c0_i32_1 = arith.constant 0 : i32
    return %c0_i32, %c0_i32_0 : i32, i32
  }
  func.func @transform_7(%arg0: i32) -> (i32, i32) {
    %c0_i32 = arith.constant 0 : i32
    %c0_i32_0 = arith.constant 0 : i32
    %c0_i32_1 = arith.constant 0 : i32
    return %c0_i32, %c0_i32_0 : i32, i32
  }
  func.func @transform_8(%arg0: i32) -> (i32, i32) {
    %c0_i32 = arith.constant 0 : i32
    %c0_i32_0 = arith.constant 0 : i32
    %c0_i32_1 = arith.constant 0 : i32
    return %c0_i32, %c0_i32_0 : i32, i32
  }
  func.func @transform_9(%arg0: i32) -> (i32, i32) {
    %c0_i32 = arith.constant 0 : i32
    %c0_i32_0 = arith.constant 0 : i32
    %c0_i32_1 = arith.constant 0 : i32
    return %c0_i32, %c0_i32_0 : i32, i32
  }
  func.func @transform_10(%arg0: i32) -> (i32, i32) {
    %c0_i32 = arith.constant 0 : i32
    %c0_i32_0 = arith.constant 0 : i32
    %c0_i32_1 = arith.constant 0 : i32
    return %c0_i32, %c0_i32_0 : i32, i32
  }
  func.func @transform_11(%arg0: i32) -> (i32, i32) {
    %c0_i32 = arith.constant 0 : i32
    %c0_i32_0 = arith.constant 0 : i32
    %c0_i32_1 = arith.constant 0 : i32
    return %c0_i32, %c0_i32_0 : i32, i32
  }
  func.func @transform_12(%arg0: i32) -> (i32, i32) {
    %c0_i32 = arith.constant 0 : i32
    %c0_i32_0 = arith.constant 0 : i32
    %c0_i32_1 = arith.constant 0 : i32
    return %c0_i32, %c0_i32_0 : i32, i32
  }
  func.func @transform_13(%arg0: i32) -> (i32, i32) {
    %c0_i32 = arith.constant 0 : i32
    %c0_i32_0 = arith.constant 0 : i32
    %c0_i32_1 = arith.constant 0 : i32
    return %c0_i32, %c0_i32_0 : i32, i32
  }
  func.func @transform_14(%arg0: i32) -> (i32, i32) {
    %c0_i32 = arith.constant 0 : i32
    %c0_i32_0 = arith.constant 0 : i32
    %c0_i32_1 = arith.constant 0 : i32
    return %c0_i32, %c0_i32_0 : i32, i32
  }
  func.func @transform_15(%arg0: i32) -> (i32, i32) {
    %c0_i32 = arith.constant 0 : i32
    %c0_i32_0 = arith.constant 0 : i32
    %c0_i32_1 = arith.constant 0 : i32
    return %c0_i32, %c0_i32_0 : i32, i32
  }
  func.func @transform_16(%arg0: i32) -> (i32, i32) {
    %c0_i32 = arith.constant 0 : i32
    %c0_i32_0 = arith.constant 0 : i32
    %c0_i32_1 = arith.constant 0 : i32
    return %c0_i32, %c0_i32_0 : i32, i32
  }
  func.func @transform_17(%arg0: i32) -> (i32, i32) {
    %c0_i32 = arith.constant 0 : i32
    %c0_i32_0 = arith.constant 0 : i32
    %c0_i32_1 = arith.constant 0 : i32
    return %c0_i32, %c0_i32_0 : i32, i32
  }
  func.func @transform_18(%arg0: i32) -> (i32, i32) {
    %c0_i32 = arith.constant 0 : i32
    %c0_i32_0 = arith.constant 0 : i32
    %c0_i32_1 = arith.constant 0 : i32
    return %c0_i32, %c0_i32_0 : i32, i32
  }
  func.func @transform_19(%arg0: i32) -> (i32, i32) {
    %c0_i32 = arith.constant 0 : i32
    %c0_i32_0 = arith.constant 0 : i32
    %c0_i32_1 = arith.constant 0 : i32
    return %c0_i32, %c0_i32_0 : i32, i32
  }
  func.func @transform_20(%arg0: i32) -> (i32, i32) {
    %c0_i32 = arith.constant 0 : i32
    %c0_i32_0 = arith.constant 0 : i32
    %c0_i32_1 = arith.constant 0 : i32
    return %c0_i32, %c0_i32_0 : i32, i32
  }
  func.func @transform_21(%arg0: i32) -> (i32, i32) {
    %c0_i32 = arith.constant 0 : i32
    %c0_i32_0 = arith.constant 0 : i32
    %c0_i32_1 = arith.constant 0 : i32
    return %c0_i32, %c0_i32_0 : i32, i32
  }
  func.func @transform_22(%arg0: i32) -> (i32, i32) {
    %c0_i32 = arith.constant 0 : i32
    %c0_i32_0 = arith.constant 0 : i32
    %c0_i32_1 = arith.constant 0 : i32
    return %c0_i32, %c0_i32_0 : i32, i32
  }
  func.func @transform_23(%arg0: i32) -> (i32, i32) {
    %c0_i32 = arith.constant 0 : i32
    %c0_i32_0 = arith.constant 0 : i32
    %c0_i32_1 = arith.constant 0 : i32
    return %c0_i32, %c0_i32_0 : i32, i32
  }
  func.func @transform_24(%arg0: i32) -> (i32, i32) {
    %c0_i32 = arith.constant 0 : i32
    %c0_i32_0 = arith.constant 0 : i32
    %c0_i32_1 = arith.constant 0 : i32
    return %c0_i32, %c0_i32_0 : i32, i32
  }
  func.func @transform_25(%arg0: i32) -> (i32, i32) {
    %c0_i32 = arith.constant 0 : i32
    %c0_i32_0 = arith.constant 0 : i32
    %c0_i32_1 = arith.constant 0 : i32
    return %c0_i32, %c0_i32_0 : i32, i32
  }
  func.func @transform_26(%arg0: i32) -> (i32, i32) {
    %c0_i32 = arith.constant 0 : i32
    %c0_i32_0 = arith.constant 0 : i32
    %c0_i32_1 = arith.constant 0 : i32
    return %c0_i32, %c0_i32_0 : i32, i32
  }
  func.func @transform_27(%arg0: i32) -> (i32, i32) {
    %c0_i32 = arith.constant 0 : i32
    %c0_i32_0 = arith.constant 0 : i32
    %c0_i32_1 = arith.constant 0 : i32
    return %c0_i32, %c0_i32_0 : i32, i32
  }
  func.func @transform_28(%arg0: i32) -> (i32, i32) {
    %c0_i32 = arith.constant 0 : i32
    %c0_i32_0 = arith.constant 0 : i32
    %c0_i32_1 = arith.constant 0 : i32
    return %c0_i32, %c0_i32_0 : i32, i32
  }
  func.func @transform_29(%arg0: i32) -> (i32, i32) {
    %c0_i32 = arith.constant 0 : i32
    %c0_i32_0 = arith.constant 0 : i32
    %c0_i32_1 = arith.constant 0 : i32
    return %c0_i32, %c0_i32_0 : i32, i32
  }
  func.func @transform_30(%arg0: i32) -> (i32, i32) {
    %c0_i32 = arith.constant 0 : i32
    %c0_i32_0 = arith.constant 0 : i32
    return %arg0, %c0_i32 : i32, i32
  }
  func.func @transform_31(%arg0: i32) -> (i32, i32) {
    %c0_i32 = arith.constant 0 : i32
    %c0_i32_0 = arith.constant 0 : i32
    return %arg0, %c0_i32 : i32, i32
  }
  func.func @transform_32(%arg0: i32) -> (i32, i32) {
    %c0_i32 = arith.constant 0 : i32
    %c0_i32_0 = arith.constant 0 : i32
    return %arg0, %c0_i32 : i32, i32
  }
  func.func @transform_33(%arg0: i32) -> (i32, i32) {
    %c0_i32 = arith.constant 0 : i32
    %c0_i32_0 = arith.constant 0 : i32
    return %arg0, %c0_i32 : i32, i32
  }
  func.func @transform_34(%arg0: i32) -> (i32, i32) {
    %c0_i32 = arith.constant 0 : i32
    %c0_i32_0 = arith.constant 0 : i32
    return %arg0, %c0_i32 : i32, i32
  }
  func.func @transform_35(%arg0: i32) -> (i32, i32) {
    %c0_i32 = arith.constant 0 : i32
    %c0_i32_0 = arith.constant 0 : i32
    return %arg0, %c0_i32 : i32, i32
  }
  func.func @transform_36(%arg0: i32) -> (i32, i32) {
    %c0_i32 = arith.constant 0 : i32
    %c0_i32_0 = arith.constant 0 : i32
    return %arg0, %c0_i32 : i32, i32
  }
}

</mosaic_0001>

<bundles_post_ra>
// kernel: forward.1
= control target key start
LH: loop header
LB: loop body
LE: loop exit
PB: predicated region body
PF: predicated region fallthrough
CT: control target
= control target key end

     0   :  { %s4146_s6 = smov 1   ;;  %s4147_s10 = smov 2   ;;  %s4662_s0 = inlined_call_operand.smem [shape: u32[37], index: -1, kind: input, shape index: {}] }
   0x1   :  { %s4224_s5 = sld [smem:[%s4662_s0]]   ;;  %s4148_s14 = smov 3  }
   0x2   :  { %s4229_s9 = sld [smem:[%s4662_s0 + %s4146_s6]]   ;;  %s4149_s18 = smov 4  }
   0x3   :  { %s4234_s13 = sld [smem:[%s4662_s0 + %s4147_s10]]   ;;  %s4150_s22 = smov 5  }
   0x4   :  { %s4239_s17 = sld [smem:[%s4662_s0 + %s4148_s14]]   ;;  %s4151_s26 = smov 6  }
   0x5   :  { %s4244_s21 = sld [smem:[%s4662_s0 + %s4149_s18]]   ;;  %s4152_s30 = smov 7  }
   0x6   :  { %s4249_s25 = sld [smem:[%s4662_s0 + %s4150_s22]]   ;;  %s4153_s4 = smov 8  }
   0x7   :  { %4667 = sst [smem:[#allocation49_spill]] %s4224_s5  ;;  %s4154_s10 = smov 9  }
   0x8   :  { %4668 = sst [smem:[#allocation50_spill]] %s4229_s9  ;;  %s4155_s15 = smov 10  }
   0x9   :  { %4669 = sst [smem:[#allocation51_spill]] %s4234_s13  ;;  %s4156_s20 = smov 11  }
   0xa   :  { %4670 = sst [smem:[#allocation52_spill]] %s4239_s17  ;;  %s4158_s1 = smov 13  }
   0xb   :  { %s4254_s29 = sld [smem:[%s4662_s0 + %s4151_s26]]   ;;  %s4157_s26 = smov 12  }
   0xc   :  { %s4259_s3 = sld [smem:[%s4662_s0 + %s4152_s30]]   ;;  %s4159_s7 = smov 14  }
   0xd   :  { %s4264_s8 = sld [smem:[%s4662_s0 + %s4153_s4]]   ;;  %s4161_s22 = smov 16  }
   0xe   :  { %s4269_s14 = sld [smem:[%s4662_s0 + %s4154_s10]]   ;;  %s4162_s28 = smov 17  }
   0xf   :  { %s4274_s19 = sld [smem:[%s4662_s0 + %s4155_s15]]   ;;  %s4160_s15 = smov 15  }
  0x10   :  { %s4279_s24 = sld [smem:[%s4662_s0 + %s4156_s20]]  }
  0x11   :  { %4671 = sst [smem:[#allocation53_spill]] %s4254_s29 }
  0x12   :  { %s4284_s30 = sld [smem:[%s4662_s0 + %s4157_s26]]  }
  0x13   :  { %s4289_s6 = sld [smem:[%s4662_s0 + %s4158_s1]]  }
  0x14   :  { %s4294_s12 = sld [smem:[%s4662_s0 + %s4159_s7]]   ;;  %s4163_s7 = smov 18  }
  0x15   :  { %s4299_s20 = sld [smem:[%s4662_s0 + %s4160_s15]]   ;;  %s4164_s15 = smov 19  }
  0x16   :  { %4672 = sst [smem:[#allocation54_spill]] %s4279_s24 }
  0x17   :  { %s4304_s27 = sld [smem:[%s4662_s0 + %s4161_s22]]   ;;  %s4165_s22 = smov 20  }
  0x18   :  { %s4309_s4 = sld [smem:[%s4662_s0 + %s4162_s28]]   ;;  %s4166_s28 = smov 21  }
  0x19   :  { %4673 = sst [smem:[#allocation55_spill]] %s4289_s6 }
  0x1a   :  { %4674 = sst [smem:[#allocation56_spill]] %s4294_s12 }
  0x1b   :  { %s4314_s17 = sld [smem:[%s4662_s0 + %s4163_s7]]   ;;  %s4167_s7 = smov 22  }
  0x1c   :  { %s4319_s12 = sld [smem:[%s4662_s0 + %s4164_s15]]   ;;  %s4168_s15 = smov 23  }
  0x1d   :  { %4675 = sst [smem:[#allocation57_spill]] %s4304_s27 }
  0x1e   :  { %4676 = sst [smem:[#allocation58_spill]] %s4309_s4 }
  0x1f   :  { %s4324_s13 = sld [smem:[%s4662_s0 + %s4165_s22]]   ;;  %s4169_s22 = smov 24  }
  0x20   :  { %s4329_s4 = sld [smem:[%s4662_s0 + %s4166_s28]]   ;;  %s4170_s28 = smov 25  }
  0x21   :  { %s4334_s9 = sld [smem:[%s4662_s0 + %s4167_s7]]   ;;  %s4171_s7 = smov 26  }
  0x22   :  { %4677 = sst [smem:[#allocation59_spill]] %s4319_s12 }
  0x23   :  { %s4339_s29 = sld [smem:[%s4662_s0 + %s4168_s15]]   ;;  %s4172_s15 = smov 27  }
  0x24   :  { %s4344_s5 = sld [smem:[%s4662_s0 + %s4169_s22]]   ;;  %s4173_s22 = smov 28  }
  0x25   :  { %s4354_s12 = sld [smem:[%s4662_s0 + %s4171_s7]]   ;;  %s4175_s7 = smov 30  }
  0x26   :  { %4678 = sst [smem:[#allocation60_spill]] %s4329_s4 }
  0x27   :  { %s4349_s4 = sld [smem:[%s4662_s0 + %s4170_s28]]   ;;  %s4174_s28 = smov 29  }
  0x28   :  { %s4364_s27 = sld [smem:[%s4662_s0 + %s4173_s22]]   ;;  %s4177_s22 = smov 32  }
  0x29   :  { %4679 = sst [smem:[#allocation61_spill]] %s4339_s29 }
  0x2a   :  { %s4359_s29 = sld [smem:[%s4662_s0 + %s4172_s15]]   ;;  %s4176_s15 = smov 31  }
  0x2b   :  { %s4374_s6 = sld [smem:[%s4662_s0 + %s4175_s7]]   ;;  %s4179_s7 = smov 34  }
  0x2c   :  { %s4384_s24 = sld [smem:[%s4662_s0 + %s4177_s22]]   ;;  %s4181_s22 = smov 36  }
  0x2d   :  { %4680 = sst [smem:[#allocation62_spill]] %s4349_s4 }
  0x2e   :  { %s4369_s4 = sld [smem:[%s4662_s0 + %s4174_s28]]   ;;  %s4178_s28 = smov 33  }
  0x30   :  { %4681 = sst [smem:[#allocation63_spill]] %s4359_s29 }
  0x31   :  { %4683 = sst [smem:[#allocation65_spill]] %s4374_s6 }
  0x32   :  { %s4379_s29 = sld [smem:[%s4662_s0 + %s4176_s15]]   ;;  %s4180_s15 = smov 35  }
  0x33   :  { %4685 = sst [smem:[#allocation67_spill]] %s4384_s24 }
  0x34   :  { %4682 = sst [smem:[#allocation64_spill]] %s4369_s4 }
  0x35   :  { %s4389_s4 = sld [smem:[%s4662_s0 + %s4178_s28]]  }
  0x36   :  { %s4394_s6 = sld [smem:[%s4662_s0 + %s4179_s7]]  }
  0x37   :  { %s4404_s24 = sld [smem:[%s4662_s0 + %s4181_s22]]  }
  0x38   :  { %4684 = sst [smem:[#allocation66_spill]] %s4379_s29 }
  0x39   :  { %s4399_s29 = sld [smem:[%s4662_s0 + %s4180_s15]]  }
  0x3a   :  { %79 = vsyncpa [#allocation3], 0 }
  0x3b   :  { %80 = vsyncpa [#allocation5], 0 }
  0x3c   :  { %81 = vsyncpa [#allocation8], 0 }
  0x3d   :  { %82 = vsyncpa [#allocation11], 0 }
  0x3e   :  { %83 = vsyncpa [#allocation14], 0 }
  0x3f   :  { %84 = vsyncpa [#allocation17], 0 }
  0x40   :  { %85 = vsyncpa [#allocation20], 0 }
  0x41   :  { %86 = vsyncpa [#allocation23], 0 }
  0x42   :  { %87 = vsyncpa [#allocation26], 0 }
  0x43   :  { %88 = vsyncpa [#allocation29], 0 }
  0x44   :  { %89 = vsyncpa [#allocation32], 0 }
  0x45   :  { %90 = vsyncpa [#allocation35], 0  ;;  %s4182_s28 = smov [#allocation4]   ;;  %s4183_s2 = smov [#allocation7]  }
  0x46   :  { %s117_s1 = sshll.u32 %s4182_s28, 4  ;;  %s138_s7 = sshll.u32 %s4183_s2, 4  ;;  %s118_s1 = int_to_ptr.vmem [resolvable:$true] %s117_s1  ;;  %s139_s7 = int_to_ptr.vmem [resolvable:$true] %s138_s7 }
  0x47   :  { %s3670_s0 = scalar_lea.vmem %s118_s1, 16  ;;  %s3674_s10 = scalar_lea.vmem %s118_s1, 32 }
  0x48   :  { %p3671_p0 = scmp.ne.s32.totalorder %s118_s1, %s3670_s0  ;;  %p3675_p1 = scmp.lt.s32.totalorder %s118_s1, %s118_s1 }
  0x49   :  { %p3676_p2 = scmp.lt.s32.totalorder %s3674_s10, %s3670_s0 }
  0x4b   :  { %p3677_p3 = por %p3676_p2, %p3675_p1 }
  0x4d   :  { %p3678_p4 = pnand %p3677_p3, %p3671_p0 }
  0x4f   :  { %3681 = shalt.err (!%p3678_p4)
}
  0x50   :  { %120 = dma.hbm_to_vmem [thread:$0]  %s4249_s25, 16, %s118_s1, [#allocation5]  }
  0x51   :  { %s3690_s11 = scalar_lea.vmem %s139_s7, 4096  ;;  %p3695_p6 = scmp.lt.s32.totalorder %s139_s7, %s139_s7 }
  0x52   :  { %p3691_p5 = scmp.ne.s32.totalorder %s139_s7, %s3690_s11  ;;  %p3696_p7 = scmp.lt.s32.totalorder %s3690_s11, %s3690_s11 }
  0x54   :  { %p3697_p8 = por %p3696_p7, %p3695_p6 }
  0x56   :  { %p3698_p9 = pnand %p3697_p8, %p3691_p5 }
  0x58   :  { %3701 = shalt.err (!%p3698_p9)
}
  0x59   :  { %s4184_s15 = smov 256   ;;  %s4185_s16 = smov 16  }
  0x5a   :  { %144 = dma.hbm_to_vmem [thread:$0]  %s4264_s8, 4096, %s139_s7, [#allocation8], %s4184_s15, %s4184_s15, %s4185_s16  }
  0x5b   :  { %s4186_s18 = smov [#allocation10]   ;;  %s4187_s23 = smov [#allocation13]  }
  0x5c   :  { %s160_s22 = sshll.u32 %s4186_s18, 4  ;;  %s184_s26 = sshll.u32 %s4187_s23, 4  ;;  %s161_s22 = int_to_ptr.vmem [resolvable:$true] %s160_s22  ;;  %s185_s26 = int_to_ptr.vmem [resolvable:$true] %s184_s26 }
  0x5d   :  { %s3710_s28 = scalar_lea.vmem %s161_s22, 1024  ;;  %p3715_p11 = scmp.lt.s32.totalorder %s161_s22, %s161_s22 }
  0x5e   :  { %p3711_p10 = scmp.ne.s32.totalorder %s161_s22, %s3710_s28  ;;  %p3716_p12 = scmp.lt.s32.totalorder %s3710_s28, %s3710_s28 }
  0x60   :  { %p3717_p13 = por %p3716_p12, %p3715_p11 }
  0x62   :  { %p3718_p0 = pnand %p3717_p13, %p3711_p10 }
  0x64   :  { %3721 = shalt.err (!%p3718_p0)
}
  0x65   :  { %s4188_s25 = smov 64   ;;  %s4189_s1 = smov 4  }
  0x66   :  { %166 = dma.hbm_to_vmem [thread:$0]  %s4274_s19, 1024, %s161_s22, [#allocation11], %s4188_s25, %s4188_s25, %s4189_s1  }
  0x67   :  { %s3730_s8 = scalar_lea.vmem %s185_s26, 2048  ;;  %p3735_p2 = scmp.lt.s32.totalorder %s185_s26, %s185_s26 }
  0x68   :  { %p3731_p1 = scmp.ne.s32.totalorder %s185_s26, %s3730_s8  ;;  %p3736_p3 = scmp.lt.s32.totalorder %s3730_s8, %s3730_s8 }
  0x6a   :  { %p3737_p4 = por %p3736_p3, %p3735_p2 }
  0x6c   :  { %p3738_p5 = pnand %p3737_p4, %p3731_p1 }
  0x6e   :  { %3741 = shalt.err (!%p3738_p5)
}
  0x6f   :  { %190 = dma.hbm_to_vmem [thread:$0]  %s4284_s30, 2048, %s185_s26, [#allocation14], %s4188_s25, %s4188_s25, %s4189_s1  }
  0x70   :  { %s4190_s2 = smov [#allocation16]   ;;  %s4191_s0 = smov [#allocation19]  }
  0x71   :  { %s209_s7 = sshll.u32 %s4190_s2, 4  ;;  %s232_s10 = sshll.u32 %s4191_s0, 4  ;;  %s210_s7 = int_to_ptr.vmem [resolvable:$true] %s209_s7  ;;  %s233_s10 = int_to_ptr.vmem [resolvable:$true] %s232_s10 }
  0x72   :  { %s3750_s11 = scalar_lea.vmem %s210_s7, 16  ;;  %s3754_s19 = scalar_lea.vmem %s210_s7, 32 }
  0x73   :  { %p3751_p6 = scmp.ne.s32.totalorder %s210_s7, %s3750_s11  ;;  %p3755_p7 = scmp.lt.s32.totalorder %s210_s7, %s210_s7 }
  0x74   :  { %p3756_p8 = scmp.lt.s32.totalorder %s3754_s19, %s3750_s11 }
  0x76   :  { %p3757_p9 = por %p3756_p8, %p3755_p7 }
  0x78   :  { %p3758_p10 = pnand %p3757_p9, %p3751_p6 }
  0x7a   :  { %3761 = shalt.err (!%p3758_p10)
}
  0x7b   :  { %212 = dma.hbm_to_vmem [thread:$0]  %s4299_s20, 16, %s210_s7, [#allocation17]  }
  0x7c   :  { %s3770_s15 = scalar_lea.vmem %s233_s10, 1024  ;;  %p3775_p12 = scmp.lt.s32.totalorder %s233_s10, %s233_s10 }
  0x7d   :  { %p3771_p11 = scmp.ne.s32.totalorder %s233_s10, %s3770_s15  ;;  %p3776_p13 = scmp.lt.s32.totalorder %s3770_s15, %s3770_s15 }
  0x7f   :  { %p3777_p0 = por %p3776_p13, %p3775_p12 }
  0x81   :  { %p3778_p1 = pnand %p3777_p0, %p3771_p11 }
  0x83   :  { %3781 = shalt.err (!%p3778_p1)
}
  0x84   :  { %238 = dma.hbm_to_vmem [thread:$0]  %s4314_s17, 1024, %s233_s10, [#allocation20], %s4188_s25, %s4188_s25, %s4189_s1  }
  0x85   :  { %s4192_s30 = smov [#allocation22]   ;;  %s4193_s18 = smov [#allocation25]  }
  0x86   :  { %s254_s16 = sshll.u32 %s4192_s30, 4  ;;  %s276_s22 = sshll.u32 %s4193_s18, 4  ;;  %s255_s16 = int_to_ptr.vmem [resolvable:$true] %s254_s16  ;;  %s277_s22 = int_to_ptr.vmem [resolvable:$true] %s276_s22 }
  0x87   :  { %s3790_s23 = scalar_lea.vmem %s255_s16, 1024  ;;  %p3795_p3 = scmp.lt.s32.totalorder %s255_s16, %s255_s16 }
  0x88   :  { %p3791_p2 = scmp.ne.s32.totalorder %s255_s16, %s3790_s23  ;;  %p3796_p4 = scmp.lt.s32.totalorder %s3790_s23, %s3790_s23 }
  0x8a   :  { %p3797_p5 = por %p3796_p4, %p3795_p3 }
  0x8c   :  { %p3798_p6 = pnand %p3797_p5, %p3791_p2 }
  0x8e   :  { %3801 = shalt.err (!%p3798_p6)
}
  0x8f   :  { %260 = dma.hbm_to_vmem [thread:$0]  %s4324_s13, 1024, %s255_s16, [#allocation23], %s4188_s25, %s4188_s25, %s4189_s1  }
  0x90   :  { %s3810_s20 = scalar_lea.vmem %s277_s22, 2048  ;;  %p3815_p8 = scmp.lt.s32.totalorder %s277_s22, %s277_s22 }
  0x91   :  { %p3811_p7 = scmp.ne.s32.totalorder %s277_s22, %s3810_s20  ;;  %p3816_p9 = scmp.lt.s32.totalorder %s3810_s20, %s3810_s20 }
  0x93   :  { %p3817_p10 = por %p3816_p9, %p3815_p8 }
  0x95   :  { %p3818_p11 = pnand %p3817_p10, %p3811_p7 }
  0x97   :  { %3821 = shalt.err (!%p3818_p11)
}
  0x98   :  { %s4194_s17 = smov 128   ;;  %s4195_s26 = smov 8  }
  0x99   :  { %282 = dma.hbm_to_vmem [thread:$0]  %s4334_s9, 2048, %s277_s22, [#allocation26], %s4194_s17, %s4194_s17, %s4195_s26  }
  0x9a   :  { %s4196_s28 = smov [#allocation28]   ;;  %s4197_s2 = smov [#allocation31]  }
  0x9b   :  { %s298_s8 = sshll.u32 %s4196_s28, 4  ;;  %s320_s7 = sshll.u32 %s4197_s2, 4  ;;  %s299_s8 = int_to_ptr.vmem [resolvable:$true] %s298_s8  ;;  %s321_s7 = int_to_ptr.vmem [resolvable:$true] %s320_s7 }
  0x9c   :  { %s3830_s0 = scalar_lea.vmem %s299_s8, 1024  ;;  %p3835_p13 = scmp.lt.s32.totalorder %s299_s8, %s299_s8 }
  0x9d   :  { %p3831_p12 = scmp.ne.s32.totalorder %s299_s8, %s3830_s0  ;;  %p3836_p0 = scmp.lt.s32.totalorder %s3830_s0, %s3830_s0 }
  0x9f   :  { %p3837_p1 = por %p3836_p0, %p3835_p13 }
  0xa1   :  { %p3838_p2 = pnand %p3837_p1, %p3831_p12 }
  0xa3   :  { %3841 = shalt.err (!%p3838_p2)
}
  0xa4   :  { %304 = dma.hbm_to_vmem [thread:$0]  %s4344_s5, 1024, %s299_s8, [#allocation29], %s4188_s25, %s4188_s25, %s4189_s1  }
  0xa5   :  { %s3850_s13 = scalar_lea.vmem %s321_s7, 1024  ;;  %p3855_p4 = scmp.lt.s32.totalorder %s321_s7, %s321_s7 }
  0xa6   :  { %p3851_p3 = scmp.ne.s32.totalorder %s321_s7, %s3850_s13  ;;  %p3856_p5 = scmp.lt.s32.totalorder %s3850_s13, %s3850_s13 }
  0xa8   :  { %p3857_p6 = por %p3856_p5, %p3855_p4 }
  0xaa   :  { %p3858_p7 = pnand %p3857_p6, %p3851_p3 }
  0xac   :  { %3861 = shalt.err (!%p3858_p7)
}
  0xad   :  { %326 = dma.hbm_to_vmem [thread:$0]  %s4354_s12, 1024, %s321_s7, [#allocation32], %s4188_s25, %s4188_s25, %s4189_s1  }
  0xae   :  { %s4198_s9 = smov [#allocation34]  }
  0xaf   :  { %s342_s10 = sshll.u32 %s4198_s9, 4  ;;  %s343_s10 = int_to_ptr.vmem [resolvable:$true] %s342_s10 }
  0xb0   :  { %s3870_s11 = scalar_lea.vmem %s343_s10, 5120  ;;  %p3875_p9 = scmp.lt.s32.totalorder %s343_s10, %s343_s10 }
  0xb1   :  { %p3871_p8 = scmp.ne.s32.totalorder %s343_s10, %s3870_s11  ;;  %p3876_p10 = scmp.lt.s32.totalorder %s3870_s11, %s3870_s11 }
  0xb3   :  { %p3877_p11 = por %p3876_p10, %p3875_p9 }
  0xb5   :  { %p3878_p12 = pnand %p3877_p11, %p3871_p8 }
  0xb7   :  { %3881 = shalt.err (!%p3878_p12)
}
  0xb8   :  { %s4199_s5 = smov 320   ;;  %s4200_s19 = smov 20  }
  0xb9   :  { %348 = dma.hbm_to_vmem [thread:$0]  %s4364_s27, 5120, %s343_s10, [#allocation35], %s4199_s5, %s4199_s5, %s4200_s19  }
  0xba   :  { %s4201_s15 = smov [#allocation2]   ;;  %s4202_s16 = smov [#allocation6]  }
  0xbb   :  { %s104_s30 = sshll.u32 %s4201_s15, 4  ;;  %s129_s18 = sshll.u32 %s4202_s16, 4  ;;  %s105_s30 = int_to_ptr.vmem [resolvable:$true] %s104_s30  ;;  %s130_s18 = int_to_ptr.vmem [resolvable:$true] %s129_s18 }
  0xbc   :  { %s3890_s12 = scalar_lea.vmem %s105_s30, 2048  ;;  %p3895_p0 = scmp.lt.s32.totalorder %s105_s30, %s105_s30 }
  0xbd   :  { %p3891_p13 = scmp.ne.s32.totalorder %s105_s30, %s3890_s12  ;;  %p3896_p1 = scmp.lt.s32.totalorder %s3890_s12, %s3890_s12 }
  0xbf   :  { %p3897_p2 = por %p3896_p1, %p3895_p0 }
  0xc1   :  { %p3898_p3 = pnand %p3897_p2, %p3891_p13 }
  0xc3   :  { %3901 = shalt.err (!%p3898_p3)
}
  0xc4   :  { %110 = dma.hbm_to_vmem [thread:$0]  %s4244_s21, 2048, %s105_s30, [#allocation3], %s4188_s25, %s4188_s25, %s4189_s1  }
  0xc5   :  { %s3910_s22 = scalar_lea.vmem %s130_s18, 16  ;;  %s3914_s27 = scalar_lea.vmem %s130_s18, 32 }
  0xc6   :  { %p3911_p4 = scmp.ne.s32.totalorder %s130_s18, %s3910_s22  ;;  %p3915_p5 = scmp.lt.s32.totalorder %s130_s18, %s130_s18 }
  0xc7   :  { %p3916_p6 = scmp.lt.s32.totalorder %s3914_s27, %s3910_s22 }
  0xc9   :  { %p3917_p7 = por %p3916_p6, %p3915_p5 }
  0xcb   :  { %p3918_p8 = pnand %p3917_p7, %p3911_p4 }
  0xcd   :  { %3921 = shalt.err (!%p3918_p8)
}
  0xce   :  { %132 = dma.hbm_to_vmem [thread:$0]  %s4259_s3, 16, %s130_s18, [#allocation5]  }
  0xcf   :  { %s4203_s23 = smov [#allocation9]   ;;  %s4204_s17 = smov [#allocation12]  }
  0xd0   :  { %s151_s20 = sshll.u32 %s4203_s23, 4  ;;  %s172_s26 = sshll.u32 %s4204_s17, 4  ;;  %s152_s20 = int_to_ptr.vmem [resolvable:$true] %s151_s20  ;;  %s173_s26 = int_to_ptr.vmem [resolvable:$true] %s172_s26 }
  0xd1   :  { %s3930_s28 = scalar_lea.vmem %s152_s20, 64  ;;  %p3935_p10 = scmp.lt.s32.totalorder %s152_s20, %s152_s20 }
  0xd2   :  { %p3931_p9 = scmp.ne.s32.totalorder %s152_s20, %s3930_s28  ;;  %p3936_p11 = scmp.lt.s32.totalorder %s3930_s28, %s3930_s28 }
  0xd4   :  { %p3937_p12 = por %p3936_p11, %p3935_p10 }
  0xd6   :  { %p3938_p13 = pnand %p3937_p12, %p3931_p9 }
  0xd8   :  { %3941 = shalt.err (!%p3938_p13)
}
  0xd9   :  { %154 = dma.hbm_to_vmem [thread:$0]  %s4269_s14, 64, %s152_s20, [#allocation8]  }
  0xda   :  { %s3950_s21 = scalar_lea.vmem %s173_s26, 1024  ;;  %p3955_p1 = scmp.lt.s32.totalorder %s173_s26, %s173_s26 }
  0xdb   :  { %p3951_p0 = scmp.ne.s32.totalorder %s173_s26, %s3950_s21  ;;  %p3956_p2 = scmp.lt.s32.totalorder %s3950_s21, %s3950_s21 }
  0xdd   :  { %p3957_p3 = por %p3956_p2, %p3955_p1 }
  0xdf   :  { %p3958_p4 = pnand %p3957_p3, %p3951_p0 }
  0xe1   :  { %3961 = shalt.err (!%p3958_p4)
}
  0xe2   :  { %s4686_s3 = sld [smem:[#allocation54_spill]]  ;;  %s4205_s8 = smov [#allocation15]  }
  0xe3   :  { %s197_s2 = sshll.u32 %s4205_s8, 4  ;;  %s4206_s7 = smov [#allocation18]   ;;  %s198_s2 = int_to_ptr.vmem [resolvable:$true] %s197_s2 }
  0xe4   :  { %s218_s0 = sshll.u32 %s4206_s7, 4  ;;  %s3970_s13 = scalar_lea.vmem %s198_s2, 16  ;;  %s219_s0 = int_to_ptr.vmem [resolvable:$true] %s218_s0 }
  0xe5   :  { %p3971_p5 = scmp.ne.s32.totalorder %s198_s2, %s3970_s13  ;;  %s3974_s14 = scalar_lea.vmem %s198_s2, 32 }
  0xe6   :  { %p3975_p6 = scmp.lt.s32.totalorder %s198_s2, %s198_s2  ;;  %p3976_p7 = scmp.lt.s32.totalorder %s3974_s14, %s3970_s13 }
  0xe8   :  { %178 = dma.hbm_to_vmem [thread:$0]  %s4686_s3, 1024, %s173_s26, [#allocation11], %s4188_s25, %s4188_s25, %s4189_s1  }
  0xe9   :  { %p3977_p8 = por %p3976_p7, %p3975_p6 }
  0xeb   :  { %p3978_p9 = pnand %p3977_p8, %p3971_p5 }
  0xed   :  { %3981 = shalt.err (!%p3978_p9)
}
  0xee   :  { %s4687_s9 = sld [smem:[#allocation55_spill]]  ;;  %s3990_s10 = scalar_lea.vmem %s219_s0, 1024 }
  0xef   :  { %p3991_p10 = scmp.ne.s32.totalorder %s219_s0, %s3990_s10  ;;  %p3995_p11 = scmp.lt.s32.totalorder %s219_s0, %s219_s0 }
  0xf0   :  { %p3996_p12 = scmp.lt.s32.totalorder %s3990_s10, %s3990_s10 }
  0xf2   :  { %p3997_p13 = por %p3996_p12, %p3995_p11 }
  0xf4   :  { %200 = dma.hbm_to_vmem [thread:$0]  %s4687_s9, 16, %s198_s2, [#allocation14]  }
  0xf5   :  { %p3998_p0 = pnand %p3997_p13, %p3991_p10 }
  0xf7   :  { %4001 = shalt.err (!%p3998_p0)
}
  0xf8   :  { %s4688_s11 = sld [smem:[#allocation57_spill]]  ;;  %s4207_s5 = smov [#allocation21]  }
  0xf9   :  { %s245_s19 = sshll.u32 %s4207_s5, 4  ;;  %s4208_s15 = smov [#allocation24]   ;;  %s246_s19 = int_to_ptr.vmem [resolvable:$true] %s245_s19 }
  0xfa   :  { %s267_s30 = sshll.u32 %s4208_s15, 4  ;;  %s4010_s16 = scalar_lea.vmem %s246_s19, 16  ;;  %s268_s30 = int_to_ptr.vmem [resolvable:$true] %s267_s30 }
  0xfb   :  { %p4011_p1 = scmp.ne.s32.totalorder %s246_s19, %s4010_s16  ;;  %s4014_s18 = scalar_lea.vmem %s246_s19, 32 }
  0xfc   :  { %p4015_p2 = scmp.lt.s32.totalorder %s246_s19, %s246_s19  ;;  %p4016_p3 = scmp.lt.s32.totalorder %s4014_s18, %s4010_s16 }
  0xfe   :  { %224 = dma.hbm_to_vmem [thread:$0]  %s4688_s11, 1024, %s219_s0, [#allocation17], %s4188_s25, %s4188_s25, %s4189_s1  }
  0xff   :  { %p4017_p4 = por %p4016_p3, %p4015_p2 }
 0x101   :  { %p4018_p5 = pnand %p4017_p4, %p4011_p1 }
 0x103   :  { %4021 = shalt.err (!%p4018_p5)
}
 0x104   :  { %s4689_s12 = sld [smem:[#allocation59_spill]]  ;;  %s4030_s22 = scalar_lea.vmem %s268_s30, 16 }
 0x105   :  { %p4031_p6 = scmp.ne.s32.totalorder %s268_s30, %s4030_s22  ;;  %s4034_s27 = scalar_lea.vmem %s268_s30, 32 }
 0x106   :  { %p4035_p7 = scmp.lt.s32.totalorder %s268_s30, %s268_s30  ;;  %p4036_p8 = scmp.lt.s32.totalorder %s4034_s27, %s4030_s22 }
 0x108   :  { %p4037_p9 = por %p4036_p8, %p4035_p7 }
 0x10a   :  { %248 = dma.hbm_to_vmem [thread:$0]  %s4689_s12, 16, %s246_s19, [#allocation20]  }
 0x10b   :  { %p4038_p10 = pnand %p4037_p9, %p4031_p6 }
 0x10d   :  { %4041 = shalt.err (!%p4038_p10)
}
 0x10e   :  { %s4690_s25 = sld [smem:[#allocation60_spill]]  ;;  %s4209_s1 = smov [#allocation27]  }
 0x10f   :  { %s289_s23 = sshll.u32 %s4209_s1, 4  ;;  %s4210_s20 = smov [#allocation30]   ;;  %s290_s23 = int_to_ptr.vmem [resolvable:$true] %s289_s23 }
 0x110   :  { %s311_s17 = sshll.u32 %s4210_s20, 4  ;;  %s4050_s26 = scalar_lea.vmem %s290_s23, 32  ;;  %s312_s17 = int_to_ptr.vmem [resolvable:$true] %s311_s17 }
 0x111   :  { %p4051_p11 = scmp.ne.s32.totalorder %s290_s23, %s4050_s26  ;;  %p4055_p12 = scmp.lt.s32.totalorder %s290_s23, %s290_s23 }
 0x112   :  { %p4056_p13 = scmp.lt.s32.totalorder %s4050_s26, %s4050_s26 }
 0x114   :  { %270 = dma.hbm_to_vmem [thread:$0]  %s4690_s25, 16, %s268_s30, [#allocation23]  }
 0x115   :  { %p4057_p0 = por %p4056_p13, %p4055_p12 }
 0x117   :  { %p4058_p1 = pnand %p4057_p0, %p4051_p11 }
 0x119   :  { %4061 = shalt.err (!%p4058_p1)
}
 0x11a   :  { %s4691_s28 = sld [smem:[#allocation61_spill]]  ;;  %s4070_s21 = scalar_lea.vmem %s312_s17, 16 }
 0x11b   :  { %p4071_p2 = scmp.ne.s32.totalorder %s312_s17, %s4070_s21  ;;  %s4074_s3 = scalar_lea.vmem %s312_s17, 32 }
 0x11c   :  { %p4075_p3 = scmp.lt.s32.totalorder %s312_s17, %s312_s17  ;;  %p4076_p4 = scmp.lt.s32.totalorder %s4074_s3, %s4070_s21 }
 0x11e   :  { %p4077_p5 = por %p4076_p4, %p4075_p3 }
 0x120   :  { %292 = dma.hbm_to_vmem [thread:$0]  %s4691_s28, 32, %s290_s23, [#allocation26]  }
 0x121   :  { %p4078_p6 = pnand %p4077_p5, %p4071_p2 }
 0x123   :  { %4081 = shalt.err (!%p4078_p6)
}
 0x124   :  { %s4692_s8 = sld [smem:[#allocation62_spill]]  ;;  %s4211_s2 = smov [#allocation33]  }
 0x125   :  { %s333_s7 = sshll.u32 %s4211_s2, 4  ;;  %s4212_s0 = smov [#allocation36]   ;;  %s334_s7 = int_to_ptr.vmem [resolvable:$true] %s333_s7 }
 0x126   :  { %s355_s13 = sshll.u32 %s4212_s0, 4  ;;  %s4090_s14 = scalar_lea.vmem %s334_s7, 16  ;;  %s356_s13 = int_to_ptr.vmem [resolvable:$true] %s355_s13 }
 0x127   :  { %p4091_p7 = scmp.ne.s32.totalorder %s334_s7, %s4090_s14  ;;  %s4094_s9 = scalar_lea.vmem %s334_s7, 32 }
 0x128   :  { %p4095_p8 = scmp.lt.s32.totalorder %s334_s7, %s334_s7  ;;  %p4096_p9 = scmp.lt.s32.totalorder %s4094_s9, %s4090_s14 }
 0x12a   :  { %314 = dma.hbm_to_vmem [thread:$0]  %s4692_s8, 16, %s312_s17, [#allocation29]  }
 0x12b   :  { %p4097_p10 = por %p4096_p9, %p4095_p8 }
 0x12d   :  { %p4098_p11 = pnand %p4097_p10, %p4091_p7 }
 0x12f   :  { %4101 = shalt.err (!%p4098_p11)
}
 0x130   :  { %s4693_s10 = sld [smem:[#allocation63_spill]]  ;;  %s4110_s11 = scalar_lea.vmem %s356_s13, 80 }
 0x131   :  { %p4111_p12 = scmp.ne.s32.totalorder %s356_s13, %s4110_s11  ;;  %s4114_s5 = scalar_lea.vmem %s356_s13, 96 }
 0x132   :  { %p4115_p13 = scmp.lt.s32.totalorder %s356_s13, %s356_s13  ;;  %p4116_p0 = scmp.lt.s32.totalorder %s4114_s5, %s4110_s11 }
 0x134   :  { %p4117_p1 = por %p4116_p0, %p4115_p13 }
 0x136   :  { %336 = dma.hbm_to_vmem [thread:$0]  %s4693_s10, 16, %s334_s7, [#allocation32]  }
 0x137   :  { %p4118_p2 = pnand %p4117_p1, %p4111_p12 }
 0x139   :  { %4121 = shalt.err (!%p4118_p2)
}
 0x13a   :  { %s4694_s19 = sld [smem:[#allocation64_spill]] }
 0x140   :  { %358 = dma.hbm_to_vmem [thread:$0]  %s4694_s19, 80, %s356_s13, [#allocation35]  }
 0x141   :  { %4122 = dma.done.wait [#allocation3], 2048  }
 0x142   :  { %4123 = vsyncadd [#allocation3], 4294965248 }
 0x143   :  { %4124 = dma.done.wait [#allocation5], 32  }
 0x144   :  { %4125 = vsyncadd [#allocation5], 4294967264 }
 0x145   :  { %4126 = dma.done.wait [#allocation8], 4160  }
 0x146   :  { %4127 = vsyncadd [#allocation8], 4294963136 }
 0x147   :  { %4128 = dma.done.wait [#allocation11], 2048  }
 0x148   :  { %4129 = vsyncadd [#allocation11], 4294965248 }
 0x149   :  { %4130 = dma.done.wait [#allocation14], 2064  }
 0x14a   :  { %4131 = vsyncadd [#allocation14], 4294965232 }
 0x14b   :  { %4132 = dma.done.wait [#allocation17], 1040  }
 0x14c   :  { %4133 = vsyncadd [#allocation17], 4294966256 }
 0x14d   :  { %4134 = dma.done.wait [#allocation20], 1040  }
 0x14e   :  { %4135 = vsyncadd [#allocation20], 4294966256 }
 0x14f   :  { %4136 = dma.done.wait [#allocation23], 1040  }
 0x150   :  { %4137 = vsyncadd [#allocation23], 4294966256 }
 0x151   :  { %4138 = dma.done.wait [#allocation26], 2080  }
 0x152   :  { %4139 = vsyncadd [#allocation26], 4294965216 }
 0x153   :  { %4140 = dma.done.wait [#allocation29], 1040  }
 0x154   :  { %4141 = vsyncadd [#allocation29], 4294966256 }
 0x155   :  { %4142 = dma.done.wait [#allocation32], 1040  }
 0x156   :  { %4143 = vsyncadd [#allocation32], 4294966256 }
 0x157   :  { %4144 = dma.done.wait [#allocation35], 5200  }
 0x158   :  { %4145 = vsyncadd [#allocation35], 4294962096  ;;  %v4213_v0 = vmov 0.0   ;;  %v3418_v1 = vld [vmem:[#allocation2 + $0x78] sm:$0xff]   ;;  %v3420_v3 = vld [vmem:[#allocation2 + $0x70] sm:$0xff]   ;;  %s4695_s15 = sld [smem:[#allocation49_spill]] }
 0x159   :  { %3148 = vmatprep.subr.bf16.mxu1 %v4213_v0  ;;  %v3419_v2 = vld [vmem:[#allocation2 + $0x38] sm:$0xff]   ;;  %3014 = vmatprep.subr.bf16.mxu0 %v3418_v1  ;;  %v3421_v4 = vld [vmem:[#allocation2 + $0x30] sm:$0xff]   ;;  %s4696_s30 = sld [smem:[#allocation53_spill]]  ;;  %v3422_v5 = vld [vmem:[#allocation2 + $0x68] sm:$0xff]   ;;  %vm4214_vm0 = vmmov 0   ;;  %vm2095_vm2 = vcmask 7168  }
 0x15a   :  { %3015 = vmatpush3.bf16.msra.mxu0 %v3419_v2  ;;  %v3423_v6 = vld [vmem:[#allocation2 + $0x28] sm:$0xff]   ;;  %v3424_v7 = vld [vmem:[#allocation2 + $0x60] sm:$0xff]   ;;  %v3426_v9 = vld [vmem:[#allocation2 + $0x58] sm:$0xff]   ;;  %3164 = vmatprep.mubr.msk.bf16.mxu1 %vm4214_vm0, %v4213_v0  ;;  %s4697_s16 = sld [smem:[#allocation65_spill]] }
 0x15b   :  { %3016 = vmatprep.subr.bf16.mxu0 %v3420_v3  ;;  %v3425_v8 = vld [vmem:[#allocation2 + $0x20] sm:$0xff]   ;;  %v3427_v10 = vld [vmem:[#allocation2 + $0x18] sm:$0xff]   ;;  %v3428_v11 = vld [vmem:[#allocation2 + $0x50] sm:$0xff]   ;;  %s4698_s18 = sld [smem:[#allocation50_spill]] }
 0x15c   :  { %v3429_v15 = vld [vmem:[#allocation2 + $0x10] sm:$0xff]   ;;  %v3430_v16 = vld [vmem:[#allocation2 + $0x48] sm:$0xff]   ;;  %v3432_v19 = vld [vmem:[#allocation2 + $0x40] sm:$0xff]   ;;  %s4699_s12 = sld [smem:[#allocation51_spill]] }
 0x15d   :  { %v3431_v18 = vld [vmem:[#allocation2 + $0x8] sm:$0xff]   ;;  %v3433_v21 = vld [vmem:[#allocation2] sm:$0xff]   ;;  %s4700_s22 = sld [smem:[#allocation66_spill]] }
 0x15e   :  { %3017 = vmatpush3.bf16.msra.mxu0 %v3421_v4  ;;  %v430_v12 = vld [vmem:[%s4695_s15 + $0x8] sm:$0xff]  ;;  %v429_v22 = vld [vmem:[%s4695_s15] sm:$0xff]  ;;  %s4701_s27 = sld [smem:[#allocation67_spill]] }
 0x15f   :  { %3018 = vmatprep.subr.bf16.mxu0 %v3422_v5  ;;  %v4458_v13 = vpack.c.bf16 %v430_v12, %v430_v12  ;;  %v3434_v14 = vld [vmem:[%s4696_s30 + $0x38] sm:$0xff]   ;;  %v3435_v17 = vld [vmem:[%s4696_s30 + $0x30] sm:$0xff]   ;;  %v3436_v20 = vld [vmem:[%s4696_s30 + $0x28] sm:$0xff]   ;;  %v4469_v24 = vpack.c.bf16 %v429_v22, %v429_v22  ;;  %s4702_s25 = sld [smem:[#allocation56_spill]] }
 0x160   :  { %3149 = vmatpush3.bf16.msra.mxu1 %v3434_v14  ;;  %v3437_v23 = vld [vmem:[%s4696_s30 + $0x20] sm:$0xff]   ;;  %v3438_v25 = vld [vmem:[%s4696_s30 + $0x18] sm:$0xff]   ;;  %v3439_v26 = vld [vmem:[%s4696_s30 + $0x10] sm:$0xff]   ;;  %s4703_s1 = sld [smem:[#allocation58_spill]] }
 0x161   :  { %600 = vmatprep.mubr.bf16.mxu0 %v4458_v13  ;;  %3150 = vmatprep.subr.bf16.mxu1 %v4213_v0  ;;  %v3440_v27 = vld [vmem:[%s4696_s30 + $0x8] sm:$0xff]   ;;  %v3441_v28 = vld [vmem:[%s4696_s30] sm:$0xff]   ;;  %v3493_v22 = vld [vmem:[#allocation10 + $0x30] sm:$0xff]   ;;  %s4704_s23 = sld [smem:[#allocation52_spill]] }
 0x162   :  { %3019 = vmatpush3.bf16.msra.mxu0 %v3423_v6  ;;  %v3442_v29 = vld [vmem:[#allocation7 + $0xe0] ss:$16 sps:$4 sm:$0xff]   ;;  %v3444_v30 = vld [vmem:[#allocation7 + $0xe4] ss:$16 sps:$4 sm:$0xff]   ;;  %v3447_v31 = vld [vmem:[#allocation7 + $0xec] ss:$16 sps:$4 sm:$0xff]  }
 0x163   :  { %3020 = vmatprep.subr.bf16.mxu0 %v3424_v7  ;;  %v3450_v32 = vld [vmem:[#allocation7 + $0xc4] ss:$16 sps:$4 sm:$0xff]   ;;  %v3448_v33 = vld [vmem:[#allocation7 + $0xc0] ss:$16 sps:$4 sm:$0xff]   ;;  %v2811_v43 = vld [vmem:[#allocation4] ss:$0 sm:$0xff] }
 0x164   :  { %3151 = vmatpush3.bf16.msra.mxu1 %v3435_v17  ;;  %v3456_v34 = vld [vmem:[#allocation7 + $0xa4] ss:$16 sps:$4 sm:$0xff]   ;;  %v3454_v35 = vld [vmem:[#allocation7 + $0xa0] ss:$16 sps:$4 sm:$0xff]   ;;  %v3445_v51 = vld [vmem:[#allocation7 + $0xe8] ss:$16 sps:$4 sm:$0xff]  }
 0x165   :  { %3152 = vmatprep.subr.bf16.mxu1 %v4213_v0  ;;  %v3462_v36 = vld [vmem:[#allocation7 + $0x84] ss:$16 sps:$4 sm:$0xff]   ;;  %v3460_v37 = vld [vmem:[#allocation7 + $0x80] ss:$16 sps:$4 sm:$0xff]   ;;  %v3453_v53 = vld [vmem:[#allocation7 + $0xcc] ss:$16 sps:$4 sm:$0xff]  }
 0x166   :  { %3021 = vmatpush3.bf16.msra.mxu0 %v3425_v8  ;;  %v3468_v38 = vld [vmem:[#allocation7 + $0x64] ss:$16 sps:$4 sm:$0xff]   ;;  %v3466_v39 = vld [vmem:[#allocation7 + $0x60] ss:$16 sps:$4 sm:$0xff]   ;;  %v3451_v54 = vld [vmem:[#allocation7 + $0xc8] ss:$16 sps:$4 sm:$0xff]  }
 0x167   :  { %3022 = vmatprep.subr.bf16.mxu0 %v3426_v9  ;;  %v3474_v40 = vld [vmem:[#allocation7 + $0x44] ss:$16 sps:$4 sm:$0xff]   ;;  %v3472_v41 = vld [vmem:[#allocation7 + $0x40] ss:$16 sps:$4 sm:$0xff]   ;;  %v3459_v55 = vld [vmem:[#allocation7 + $0xac] ss:$16 sps:$4 sm:$0xff]  }
 0x168   :  { %3153 = vmatpush3.bf16.msra.mxu1 %v3436_v20  ;;  %v3457_v56 = vld [vmem:[#allocation7 + $0xa8] ss:$16 sps:$4 sm:$0xff]   ;;  %v3465_v57 = vld [vmem:[#allocation7 + $0x8c] ss:$16 sps:$4 sm:$0xff]   ;;  %v3480_v63 = vld [vmem:[#allocation7 + $0x24] ss:$16 sps:$4 sm:$0xff]  }
 0x169   :  { %3154 = vmatprep.subr.bf16.mxu1 %v4213_v0  ;;  %v3463_v58 = vld [vmem:[#allocation7 + $0x88] ss:$16 sps:$4 sm:$0xff]   ;;  %v3471_v59 = vld [vmem:[#allocation7 + $0x6c] ss:$16 sps:$4 sm:$0xff]   ;;  %v3478_v2 = vld [vmem:[#allocation7 + $0x20] ss:$16 sps:$4 sm:$0xff]  }
 0x16a   :  { %3023 = vmatpush3.bf16.msra.mxu0 %v3427_v10  ;;  %v3469_v60 = vld [vmem:[#allocation7 + $0x68] ss:$16 sps:$4 sm:$0xff]   ;;  %v3477_v61 = vld [vmem:[#allocation7 + $0x4c] ss:$16 sps:$4 sm:$0xff]   ;;  %v3486_v4 = vld [vmem:[#allocation7 + $0x4] ss:$16 sps:$4 sm:$0xff]  }
 0x16b   :  { %3024 = vmatprep.subr.bf16.mxu0 %v3428_v11  ;;  %v3475_v62 = vld [vmem:[#allocation7 + $0x48] ss:$16 sps:$4 sm:$0xff]   ;;  %v3483_v1 = vld [vmem:[#allocation7 + $0x2c] ss:$16 sps:$4 sm:$0xff]   ;;  %v3484_v6 = vld [vmem:[#allocation7] ss:$16 sps:$4 sm:$0xff]  }
 0x16c   :  { %3155 = vmatpush3.bf16.msra.mxu1 %v3437_v23  ;;  %v3481_v3 = vld [vmem:[#allocation7 + $0x28] ss:$16 sps:$4 sm:$0xff]   ;;  %v3489_v5 = vld [vmem:[#allocation7 + $0xc] ss:$16 sps:$4 sm:$0xff]   ;;  %v4215_v8 = vmov 0  }
 0x16d   :  { %3156 = vmatprep.subr.bf16.mxu1 %v4213_v0  ;;  %v3487_v7 = vld [vmem:[#allocation7 + $0x8] ss:$16 sps:$4 sm:$0xff]   ;;  %v2828_v9 = vld [vmem:[#allocation6] ss:$0 sm:$0xff]  ;;  %v3494_v23 = vld [vmem:[#allocation12 + $0x28] sm:$0xff]  }
 0x16e   :  { %3025 = vmatpush3.bf16.msra.mxu0 %v3429_v15 }
 0x16f   :  { %3026 = vmatprep.subr.bf16.mxu0 %v3430_v16 }
 0x170   :  { %3157 = vmatpush3.bf16.msra.mxu1 %v3438_v25  ;;  %v3495_v25 = vld [vmem:[#allocation10 + $0x28] sm:$0xff]  }
 0x171   :  { %3158 = vmatprep.subr.bf16.mxu1 %v4213_v0 }
 0x172   :  { %3027 = vmatpush3.bf16.msra.mxu0 %v3431_v18  ;;  %v3490_v18 = vld [vmem:[#allocation12 + $0x38] sm:$0xff]  }
 0x173   :  { %3028 = vmatprep.subr.bf16.mxu0 %v3432_v19  ;;  %v3491_v19 = vld [vmem:[#allocation10 + $0x38] sm:$0xff]  }
 0x174   :  { %3159 = vmatpush3.bf16.msra.mxu1 %v3439_v26  ;;  %v3496_v26 = vld [vmem:[#allocation12 + $0x20] sm:$0xff]  }
 0x175   :  { %3160 = vmatprep.subr.bf16.mxu1 %v4213_v0 }
 0x176   :  { %3029 = vmatpush3.bf16.msra.mxu0 %v3433_v21  ;;  %v3492_v21 = vld [vmem:[#allocation12 + $0x30] sm:$0xff]  }
 0x177   :  { %939 = vmatprep.subr.bf16.mxu0 %v3444_v30  ;;  %v3500_v30 = vld [vmem:[#allocation12 + $0x10] sm:$0xff]  }
 0x178   :  { %3161 = vmatpush3.bf16.msra.mxu1 %v3440_v27  ;;  %v3497_v27 = vld [vmem:[#allocation10 + $0x20] sm:$0xff]  }
 0x179   :  { %601 = vmatmul.mubr.bf16.vlgmr.msra.gmra.mxu0 %v4469_v24  ;;  %3162 = vmatprep.subr.bf16.mxu1 %v4213_v0 }
 0x17a   :  { %940 = vmatpush1.bf16.msra.mxu0 %v3442_v29  ;;  %971 = vmatprep.mubr.bf16.mxu0 %v4215_v8  ;;  %v3499_v29 = vld [vmem:[#allocation10 + $0x18] sm:$0xff]  }
 0x17b   :  { %941 = vmatprep.subr.bf16.mxu0 %v3450_v32  ;;  %v3502_v32 = vld [vmem:[#allocation12 + $0x8] sm:$0xff]  }
 0x17c   :  { %3163 = vmatpush3.bf16.msra.mxu1 %v3441_v28  ;;  %v3498_v28 = vld [vmem:[#allocation12 + $0x18] sm:$0xff]  }
 0x17d   :  { %980 = vmatprep.subr.bf16.mxu1 %v3447_v31  ;;  %v3501_v31 = vld [vmem:[#allocation10 + $0x10] sm:$0xff]  }
 0x17e   :  { %942 = vmatpush1.bf16.msra.mxu0 %v3448_v33  ;;  %v3503_v33 = vld [vmem:[#allocation10 + $0x8] sm:$0xff]  }
 0x17f   :  { %943 = vmatprep.subr.bf16.mxu0 %v3456_v34  ;;  %v3504_v34 = vld [vmem:[#allocation12] sm:$0xff]  }
 0x182   :  { %944 = vmatpush1.bf16.msra.mxu0 %v3454_v35  ;;  %v3505_v35 = vld [vmem:[#allocation10] sm:$0xff]  }
 0x183   :  { %945 = vmatprep.subr.bf16.mxu0 %v3462_v36  ;;  %v3506_v36 = vld [vmem:[#allocation13 + $0x78] sm:$0xff]  }
 0x186   :  { %946 = vmatpush1.bf16.msra.mxu0 %v3460_v37  ;;  %v759_v37 = vlaneseq }
 0x187   :  { %947 = vmatprep.subr.bf16.mxu0 %v3468_v38 }
 0x188   :  { %v4506_v38 = vshrl.u32 %v759_v37, 7 }
 0x18a   :  { %948 = vmatpush1.bf16.msra.mxu0 %v3466_v39  ;;  %v4509_v39 = vsub.s32 0, %v4506_v38 }
 0x18b   :  { %949 = vmatprep.subr.bf16.mxu0 %v3474_v40  ;;  %v769_v40 = vsub.s32 2, %v4506_v38 }
 0x18e   :  { %950 = vmatpush1.bf16.msra.mxu0 %v3472_v41  ;;  %v757_v41 = vld [vmem:[#allocation9] sm:$0xf] }
 0x18f   :  { %951 = vmatprep.subr.bf16.mxu0 %v3480_v63 }
 0x192   :  { %952 = vmatpush1.bf16.msra.mxu0 %v3478_v2  ;;  %v1027_v2 = vld [vmem:[%s4699_s12] sm:$0xff] }
 0x193   :  { %953 = vmatprep.subr.bf16.mxu0 %v3486_v4 }
 0x196   :  { %954 = vmatpush1.bf16.msra.mxu0 %v3484_v6 }
 0x197   :  { %3168 = vmatprep.subr.bf16.mxu0 %v4213_v0 }
 0x239   :  { %v3030_v42 = vpop.f32.mrf.mxu0 }
 0x23b   :  { %v3031_v44 = vpop.f32.mrf.mxu0 }
 0x23c   :  { %v3032_v45 = vadd.f32 %v3031_v44, %v3030_v42  ;;  %v4513_v42 = vsub.s32 1, %v4506_v38  ;;  %v762_v44 = vrot.slane %v757_v41, %v4509_v39 }
 0x23d   :  { %v3033_v46 = vpop.f32.mrf.mxu0 }
 0x23e   :  { %v603_v47 = vadd.f32 %v3032_v45, %v2811_v43  ;;  %v773_v43 = vsub.s32 3, %v4506_v38  ;;  %v770_v45 = vrot.slane %v757_v41, %v769_v40  ;;  %v766_v46 = vrot.slane %v757_v41, %v4513_v42 }
 0x23f   :  { %v3034_v48 = vpop.f32.mrf.mxu0 }
 0x240   :  { %v608_v49 = vmul.f32 0.01, %v603_v47 }
 0x242   :  { %v609_v50 = vmax.f32 %v603_v47, %v608_v49  ;;  %v774_v47 = vrot.slane %v757_v41, %v773_v43  ;;  %v3540_v41 = vld [vmem:[#allocation18 + $0x28] sm:$0xff]  }
 0x244   :  { %v610_v52 = vpack.c.bf16 %v609_v50, %v609_v50 }
 0x246   :  { %3165 = vmatmul.mubr.bf16.vlgmr.msra.gmra.mxu1 %v610_v52 }
 0x247   :  { %981 = vmatpush1.bf16.msra.mxu1 %v3445_v51  ;;  %1012 = vmatprep.mubr.bf16.mxu1 %v4215_v8 }
 0x248   :  { %982 = vmatprep.subr.bf16.mxu1 %v3453_v53 }
 0x24b   :  { %983 = vmatpush1.bf16.msra.mxu1 %v3451_v54 }
 0x24c   :  { %984 = vmatprep.subr.bf16.mxu1 %v3459_v55 }
 0x24f   :  { %985 = vmatpush1.bf16.msra.mxu1 %v3457_v56 }
 0x250   :  { %986 = vmatprep.subr.bf16.mxu1 %v3465_v57 }
 0x253   :  { %987 = vmatpush1.bf16.msra.mxu1 %v3463_v58 }
 0x254   :  { %988 = vmatprep.subr.bf16.mxu1 %v3471_v59 }
 0x257   :  { %989 = vmatpush1.bf16.msra.mxu1 %v3469_v60 }
 0x258   :  { %990 = vmatprep.subr.bf16.mxu1 %v3477_v61 }
 0x25b   :  { %991 = vmatpush1.bf16.msra.mxu1 %v3475_v62 }
 0x25c   :  { %992 = vmatprep.subr.bf16.mxu1 %v3483_v1  ;;  %v1021_v1 = vld [vmem:[%s4698_s18] sm:$0xff] }
 0x25f   :  { %993 = vmatpush1.bf16.msra.mxu1 %v3481_v3 }
 0x260   :  { %994 = vmatprep.subr.bf16.mxu1 %v3489_v5 }
 0x263   :  { %995 = vmatpush1.bf16.msra.mxu1 %v3487_v7 }
 0x264   :  { %3188 = vmatprep.subr.bf16.mxu1 %v4213_v0 }
 0x306   :  { %v716_v10 = vpop.f32.mrf.mxu1 }
 0x307   :  { %v717_v11 = vadd.f32 %v2828_v9, %v716_v10 }
 0x308   :  { %v3166_v12 = vpop.f32.mrf.mxu1 }
 0x309   :  { %v722_v14 = vmul.f32 0.01, %v717_v11 }
 0x30a   :  { %v719_v15 = vpop.f32.mrf.mxu1 }
 0x30b   :  { %v723_v16 = vmax.f32 %v717_v11, %v722_v14  ;;  %v3507_v11 = vld [vmem:[#allocation13 + $0x38] sm:$0xff]   ;;  %v3508_v14 = vld [vmem:[#allocation13 + $0x70] sm:$0xff]  }
 0x30c   :  { %v3167_v17 = vpop.f32.mrf.mxu1  ;;  %v3509_v15 = vld [vmem:[#allocation13 + $0x30] sm:$0xff]  }
 0x30d   :  { %v724_v20 = vpack.c.bf16 %v723_v16, %v723_v16  ;;  %v3510_v16 = vld [vmem:[#allocation13 + $0x68] sm:$0xff]  }
 0x30e   :  { %v3511_v17 = vld [vmem:[#allocation13 + $0x28] sm:$0xff]  }
 0x30f   :  { %972 = vmatmul.mubr.bf16.vlgmr.msra.gmra.mxu0 %v724_v20  ;;  %1013 = vmatmul.mubr.bf16.vlgmr.msra.gmra.mxu1 %v724_v20  ;;  %v3514_v20 = vld [vmem:[#allocation13 + $0x58] sm:$0xff]  }
 0x310   :  { %3169 = vmatpush3.bf16.msra.mxu0 %v3490_v18  ;;  %3189 = vmatpush3.bf16.msra.mxu1 %v3491_v19  ;;  %v3512_v18 = vld [vmem:[#allocation13 + $0x60] sm:$0xff]  }
 0x311   :  { %3170 = vmatprep.subr.bf16.mxu0 %v4213_v0  ;;  %3190 = vmatprep.subr.bf16.mxu1 %v4213_v0  ;;  %v3513_v19 = vld [vmem:[#allocation13 + $0x20] sm:$0xff]  }
 0x312   :  { %3184 = vmatprep.mubr.msk.bf16.mxu0 %vm4214_vm0, %v4213_v0  ;;  %3204 = vmatprep.mubr.msk.bf16.mxu1 %vm4214_vm0, %v4213_v0 }
 0x314   :  { %3171 = vmatpush3.bf16.msra.mxu0 %v3492_v21  ;;  %3191 = vmatpush3.bf16.msra.mxu1 %v3493_v22  ;;  %v3515_v21 = vld [vmem:[#allocation13 + $0x18] sm:$0xff]   ;;  %v3516_v22 = vld [vmem:[#allocation13 + $0x50] sm:$0xff]  }
 0x315   :  { %3172 = vmatprep.subr.bf16.mxu0 %v4213_v0  ;;  %3192 = vmatprep.subr.bf16.mxu1 %v4213_v0 }
 0x318   :  { %3173 = vmatpush3.bf16.msra.mxu0 %v3494_v23  ;;  %3193 = vmatpush3.bf16.msra.mxu1 %v3495_v25  ;;  %v3517_v23 = vld [vmem:[#allocation13 + $0x10] sm:$0xff]   ;;  %v3519_v25 = vld [vmem:[#allocation13 + $0x8] sm:$0xff]  }
 0x319   :  { %3174 = vmatprep.subr.bf16.mxu0 %v4213_v0  ;;  %3194 = vmatprep.subr.bf16.mxu1 %v4213_v0 }
 0x31c   :  { %3175 = vmatpush3.bf16.msra.mxu0 %v3496_v26  ;;  %3195 = vmatpush3.bf16.msra.mxu1 %v3497_v27  ;;  %v3520_v26 = vld [vmem:[#allocation13 + $0x40] sm:$0xff]  }
 0x31d   :  { %3176 = vmatprep.subr.bf16.mxu0 %v4213_v0  ;;  %3196 = vmatprep.subr.bf16.mxu1 %v4213_v0  ;;  %v3521_v27 = vld [vmem:[#allocation13] sm:$0xff]  }
 0x320   :  { %3177 = vmatpush3.bf16.msra.mxu0 %v3498_v28  ;;  %3197 = vmatpush3.bf16.msra.mxu1 %v3499_v29  ;;  %v3522_v28 = vld [vmem:[%s4702_s25 + $0x38] sm:$0xff]   ;;  %v3523_v29 = vld [vmem:[%s4702_s25 + $0x30] sm:$0xff]  }
 0x321   :  { %3178 = vmatprep.subr.bf16.mxu0 %v4213_v0  ;;  %3198 = vmatprep.subr.bf16.mxu1 %v4213_v0 }
 0x324   :  { %3179 = vmatpush3.bf16.msra.mxu0 %v3500_v30  ;;  %3199 = vmatpush3.bf16.msra.mxu1 %v3501_v31  ;;  %v3524_v30 = vld [vmem:[%s4702_s25 + $0x28] sm:$0xff]   ;;  %v3525_v31 = vld [vmem:[%s4702_s25 + $0x20] sm:$0xff]  }
 0x325   :  { %3180 = vmatprep.subr.bf16.mxu0 %v4213_v0  ;;  %3200 = vmatprep.subr.bf16.mxu1 %v4213_v0 }
 0x328   :  { %3181 = vmatpush3.bf16.msra.mxu0 %v3502_v32  ;;  %3201 = vmatpush3.bf16.msra.mxu1 %v3503_v33  ;;  %v3527_v32 = vld [vmem:[%s4702_s25 + $0x10] sm:$0xff]   ;;  %v3528_v33 = vld [vmem:[%s4702_s25 + $0x8] sm:$0xff]  }
 0x329   :  { %3182 = vmatprep.subr.bf16.mxu0 %v4213_v0  ;;  %3202 = vmatprep.subr.bf16.mxu1 %v4213_v0 }
 0x32c   :  { %3183 = vmatpush3.bf16.msra.mxu0 %v3504_v34  ;;  %3203 = vmatpush3.bf16.msra.mxu1 %v3505_v35  ;;  %v3529_v34 = vld [vmem:[%s4702_s25] sm:$0xff]  }
 0x32d   :  { %3063 = vmatprep.subr.bf16.mxu0 %v3506_v36  ;;  %3208 = vmatprep.subr.bf16.mxu1 %v4213_v0  ;;  %v3538_v35 = vld [vmem:[#allocation18 + $0x38] sm:$0xff]   ;;  %v3539_v36 = vld [vmem:[#allocation18 + $0x30] sm:$0xff]  }
 0x3cf   :  { %v973_v48 = vpop.f32.mrf.mxu0  ;;  %v1014_v49 = vpop.f32.mrf.mxu1 }
 0x3d0   :  { %v974_v50 = vadd.f32 %v973_v48, %v762_v44  ;;  %v1015_v51 = vadd.f32 %v1014_v49, %v770_v45  ;;  %v3541_v44 = vld [vmem:[#allocation18 + $0x20] sm:$0xff]   ;;  %v3542_v45 = vld [vmem:[#allocation18 + $0x18] sm:$0xff]  }
 0x3d1   :  { %v975_v52 = vpop.f32.mrf.mxu0  ;;  %v1016_v53 = vpop.f32.mrf.mxu1 }
 0x3d2   :  { %1033 = vst [vmem:[%s4697_s16] sm:$0xff] %v974_v50  ;;  %1035 = vst [vmem:[%s4697_s16 + $0x10] sm:$0xff] %v1015_v51  ;;  %v976_v54 = vadd.f32 %v975_v52, %v766_v46  ;;  %v1017_v55 = vadd.f32 %v1016_v53, %v774_v47  ;;  %v3543_v46 = vld [vmem:[#allocation18 + $0x10] sm:$0xff]  }
 0x3d3   :  { %v977_v56 = vpop.f32.mrf.mxu0  ;;  %v1018_v57 = vpop.f32.mrf.mxu1 }
 0x3d4   :  { %v1022_v58 = vmul.f32 0.5, %v976_v54  ;;  %1034 = vst [vmem:[%s4697_s16 + $0x8] sm:$0xff] %v976_v54  ;;  %v1028_v59 = vmul.f32 0.5, %v1017_v55  ;;  %1036 = vst [vmem:[%s4697_s16 + $0x18] sm:$0xff] %v1017_v55 }
 0x3d5   :  { %v978_v60 = vpop.f32.mrf.mxu0  ;;  %v1019_v61 = vpop.f32.mrf.mxu1 }
 0x3d6   :  { %v1023_v62 = vmul.f32 1.442695, %v1022_v58  ;;  %v1029_v63 = vmul.f32 1.442695, %v1028_v59  ;;  %v2901_v59 = vld [vmem:[#allocation15] ss:$0 sm:$0xff] }
 0x3d8   :  { %3650 = vpow2.f32 %v1023_v62 }
 0x3d9   :  { %3652 = vpow2.f32 %v1029_v63 }
 0x3e5   :  { %v3651_v3 = vpop.eup %3650 }
 0x3e6   :  { %v3653_v4 = vpop.eup %3652  ;;  %v1025_v5 = vmul.f32 %v3651_v3, %v1021_v1  ;;  %v3530_v3 = vld [vmem:[#allocation19 + $0x38] sm:$0xff]  }
 0x3e7   :  { %v1031_v6 = vmul.f32 %v3653_v4, %v1027_v2 }
 0x3e8   :  { %v1026_v7 = vadd.f32 %v1025_v5, %v974_v50  ;;  %v3531_v5 = vld [vmem:[#allocation19 + $0x30] sm:$0xff]  }
 0x3e9   :  { %v1032_v9 = vadd.f32 %v1031_v6, %v1015_v51  ;;  %v3532_v6 = vld [vmem:[#allocation19 + $0x28] sm:$0xff]  }
 0x3ea   :  { %1037 = vst [vmem:[%s4700_s22] sm:$0xff] %v1026_v7  ;;  %v4529_v10 = vpack.c.bf16 %v1026_v7, %v1026_v7  ;;  %v3533_v7 = vld [vmem:[#allocation19 + $0x20] sm:$0xff]  }
 0x3eb   :  { %1038 = vst [vmem:[%s4701_s27] sm:$0xff] %v1032_v9  ;;  %v4532_v12 = vpack.c.bf16 %v1032_v9, %v1032_v9  ;;  %v3534_v9 = vld [vmem:[#allocation19 + $0x18] sm:$0xff]  }
 0x3ec   :  { %3205 = vmatmul.mubr.bf16.vlgmr.msra.gmra.mxu1 %v4529_v10 }
 0x3ed   :  { %3185 = vmatmul.mubr.bf16.vlgmr.msra.gmra.mxu0 %v4532_v12  ;;  %3224 = vmatprep.mubr.msk.bf16.mxu1 %vm4214_vm0, %v4213_v0 }
 0x3ee   :  { %3064 = vmatpush3.bf16.msra.mxu0 %v3507_v11  ;;  %1409 = vmatprep.mubr.bf16.mxu0 %v4458_v13  ;;  %v3518_v13 = vld [vmem:[#allocation13 + $0x48] sm:$0xff]   ;;  %v3535_v11 = vld [vmem:[#allocation19 + $0x10] sm:$0xff]  }
 0x3ef   :  { %3065 = vmatprep.subr.bf16.mxu0 %v3508_v14  ;;  %3209 = vmatpush3.bf16.msra.mxu1 %v3522_v28  ;;  %v3536_v14 = vld [vmem:[#allocation19 + $0x8] sm:$0xff]  }
 0x3f0   :  { %3210 = vmatprep.subr.bf16.mxu1 %v4213_v0  ;;  %v3548_v28 = vld [vmem:[#allocation22 + $0x28] sm:$0xff]  }
 0x3f2   :  { %3066 = vmatpush3.bf16.msra.mxu0 %v3509_v15  ;;  %v3537_v15 = vld [vmem:[#allocation19] sm:$0xff]  }
 0x3f3   :  { %3067 = vmatprep.subr.bf16.mxu0 %v3510_v16  ;;  %3211 = vmatpush3.bf16.msra.mxu1 %v3523_v29  ;;  %v3544_v16 = vld [vmem:[#allocation18 + $0x8] sm:$0xff]  }
 0x3f4   :  { %3212 = vmatprep.subr.bf16.mxu1 %v4213_v0  ;;  %v3549_v29 = vld [vmem:[#allocation22 + $0x20] sm:$0xff]  }
 0x3f6   :  { %3068 = vmatpush3.bf16.msra.mxu0 %v3511_v17  ;;  %v3545_v17 = vld [vmem:[#allocation18] sm:$0xff]  }
 0x3f7   :  { %3069 = vmatprep.subr.bf16.mxu0 %v3512_v18  ;;  %3213 = vmatpush3.bf16.msra.mxu1 %v3524_v30  ;;  %v2902_v18 = vld [vmem:[#allocation16] ss:$0 sm:$0xff] }
 0x3f8   :  { %3214 = vmatprep.subr.bf16.mxu1 %v4213_v0  ;;  %v3550_v30 = vld [vmem:[#allocation22 + $0x18] sm:$0xff]  }
 0x3fa   :  { %3070 = vmatpush3.bf16.msra.mxu0 %v3513_v19 }
 0x3fb   :  { %3071 = vmatprep.subr.bf16.mxu0 %v3514_v20  ;;  %3215 = vmatpush3.bf16.msra.mxu1 %v3525_v31  ;;  %v3551_v31 = vld [vmem:[#allocation22 + $0x10] sm:$0xff]  }
 0x3fc   :  { %3216 = vmatprep.subr.bf16.mxu1 %v4213_v0 }
 0x3fe   :  { %3072 = vmatpush3.bf16.msra.mxu0 %v3515_v21 }
 0x3ff   :  { %3073 = vmatprep.subr.bf16.mxu0 %v3516_v22 }
 0x402   :  { %3074 = vmatpush3.bf16.msra.mxu0 %v3517_v23 }
 0x403   :  { %3075 = vmatprep.subr.bf16.mxu0 %v3518_v13 }
 0x406   :  { %3076 = vmatpush3.bf16.msra.mxu0 %v3519_v25 }
 0x407   :  { %3077 = vmatprep.subr.bf16.mxu0 %v3520_v26  ;;  %v3546_v26 = vld [vmem:[#allocation22 + $0x38] sm:$0xff]  }
 0x40a   :  { %3078 = vmatpush3.bf16.msra.mxu0 %v3521_v27  ;;  %v3547_v27 = vld [vmem:[#allocation22 + $0x30] sm:$0xff]  }
 0x40b   :  { %3228 = vmatprep.subr.bf16.mxu0 %v4213_v0 }
 0x40d   :  { %1410 = vmatmul.mubr.bf16.vlgmr.msra.gmra.mxu0 %v4469_v24  ;;  %v3526_v24 = vld [vmem:[%s4702_s25 + $0x18] sm:$0xff]  }
 0x40e   :  { %3244 = vmatprep.mubr.msk.bf16.mxu0 %vm4214_vm0, %v4213_v0  ;;  %3217 = vmatpush3.bf16.msra.mxu1 %v3526_v24  ;;  %v2920_v24 = vld [vmem:[#allocation21] ss:$0 sm:$0xff] }
 0x40f   :  { %3218 = vmatprep.subr.bf16.mxu1 %v4213_v0  ;;  %3229 = vmatpush3.bf16.msra.mxu0 %v3538_v35 }
 0x410   :  { %3230 = vmatprep.subr.bf16.mxu0 %v4213_v0 }
 0x412   :  { %3219 = vmatpush3.bf16.msra.mxu1 %v3527_v32  ;;  %v3552_v32 = vld [vmem:[#allocation22 + $0x8] sm:$0xff]  }
 0x413   :  { %3220 = vmatprep.subr.bf16.mxu1 %v4213_v0  ;;  %3231 = vmatpush3.bf16.msra.mxu0 %v3539_v36  ;;  %v3553_v36 = vld [vmem:[#allocation22] sm:$0xff]  }
 0x414   :  { %3232 = vmatprep.subr.bf16.mxu0 %v4213_v0 }
 0x416   :  { %3221 = vmatpush3.bf16.msra.mxu1 %v3528_v33 }
 0x417   :  { %3222 = vmatprep.subr.bf16.mxu1 %v4213_v0  ;;  %3233 = vmatpush3.bf16.msra.mxu0 %v3540_v41 }
 0x418   :  { %3234 = vmatprep.subr.bf16.mxu0 %v4213_v0 }
 0x41a   :  { %3223 = vmatpush3.bf16.msra.mxu1 %v3529_v34 }
 0x41b   :  { %3248 = vmatprep.subr.bf16.mxu1 %v4213_v0  ;;  %3235 = vmatpush3.bf16.msra.mxu0 %v3541_v44 }
 0x41c   :  { %3236 = vmatprep.subr.bf16.mxu0 %v4213_v0 }
 0x41f   :  { %3237 = vmatpush3.bf16.msra.mxu0 %v3542_v45 }
 0x420   :  { %3238 = vmatprep.subr.bf16.mxu0 %v4213_v0 }
 0x423   :  { %3239 = vmatpush3.bf16.msra.mxu0 %v3543_v46 }
 0x424   :  { %3240 = vmatprep.subr.bf16.mxu0 %v4213_v0 }
 0x427   :  { %3241 = vmatpush3.bf16.msra.mxu0 %v3544_v16 }
 0x428   :  { %3242 = vmatprep.subr.bf16.mxu0 %v4213_v0 }
 0x42b   :  { %3243 = vmatpush3.bf16.msra.mxu0 %v3545_v17 }
 0x42c   :  { %3268 = vmatprep.subr.bf16.mxu0 %v4213_v0 }
 0x4ac   :  { %v1243_v47 = vpop.f32.mrf.mxu1 }
 0x4ad   :  { %v1155_v48 = vpop.f32.mrf.mxu0 }
 0x4ae   :  { %v3206_v49 = vpop.f32.mrf.mxu1  ;;  %v1244_v57 = vadd.f32 %v1243_v47, %v1155_v48  ;;  %v3554_v47 = vld [vmem:[#allocation28 + $0x38] sm:$0xff]  }
 0x4af   :  { %v3186_v50 = vpop.f32.mrf.mxu0  ;;  %v3555_v49 = vld [vmem:[#allocation28 + $0x30] sm:$0xff]  }
 0x4b0   :  { %v1246_v51 = vpop.f32.mrf.mxu1  ;;  %v3556_v50 = vld [vmem:[#allocation28 + $0x28] sm:$0xff]  }
 0x4b1   :  { %v1158_v52 = vpop.f32.mrf.mxu0  ;;  %v3557_v51 = vld [vmem:[#allocation28 + $0x20] sm:$0xff]  }
 0x4b2   :  { %v3207_v53 = vpop.f32.mrf.mxu1  ;;  %v3558_v52 = vld [vmem:[#allocation28 + $0x18] sm:$0xff]  }
 0x4b3   :  { %v3187_v54 = vpop.f32.mrf.mxu0  ;;  %v3559_v53 = vld [vmem:[#allocation28 + $0x10] sm:$0xff]  }
 0x4b4   :  { %v3560_v54 = vld [vmem:[#allocation28 + $0x8] sm:$0xff]  }
 0x4cd   :  { %v3079_v55 = vpop.f32.mrf.mxu0 }
 0x4cf   :  { %v3080_v56 = vpop.f32.mrf.mxu0 }
 0x4d0   :  { %v3081_v58 = vadd.f32 %v3080_v56, %v3079_v55  ;;  %v3561_v55 = vld [vmem:[#allocation28] sm:$0xff]   ;;  %v3562_v56 = vld [vmem:[#allocation25 + $0x70] ss:$8 sps:$4 sm:$0xff]  }
 0x4d1   :  { %v3082_v60 = vpop.f32.mrf.mxu0 }
 0x4d2   :  { %v1417_v61 = vadd.f32 %v3081_v58, %v1244_v57  ;;  %v3564_v57 = vld [vmem:[#allocation25 + $0x74] ss:$8 sps:$4 sm:$0xff]   ;;  %v3567_v58 = vld [vmem:[#allocation25 + $0x64] ss:$8 sps:$4 sm:$0xff]  }
 0x4d3   :  { %v3083_v62 = vpop.f32.mrf.mxu0  ;;  %v3570_v60 = vld [vmem:[#allocation25 + $0x54] ss:$8 sps:$4 sm:$0xff]  }
 0x4d4   :  { %v1425_v63 = vadd.f32 %v2901_v59, %v1417_v61  ;;  %v3565_v59 = vld [vmem:[#allocation25 + $0x60] ss:$8 sps:$4 sm:$0xff]   ;;  %v3568_v61 = vld [vmem:[#allocation25 + $0x50] ss:$8 sps:$4 sm:$0xff]   ;;  %v3573_v62 = vld [vmem:[#allocation25 + $0x44] ss:$8 sps:$4 sm:$0xff]  }
 0x4d6   :  { %v1426_v1 = vmul.f32 0.01, %v1425_v63 }
 0x4d8   :  { %v1427_v2 = vmax.f32 %v1425_v63, %v1426_v1  ;;  %v3571_v63 = vld [vmem:[#allocation25 + $0x40] ss:$8 sps:$4 sm:$0xff]   ;;  %v3576_v1 = vld [vmem:[#allocation25 + $0x34] ss:$8 sps:$4 sm:$0xff]  }
 0x4da   :  { %v1428_v4 = vpack.c.bf16 %v1427_v2, %v1427_v2  ;;  %v3579_v2 = vld [vmem:[#allocation25 + $0x24] ss:$8 sps:$4 sm:$0xff]  }
 0x4dc   :  { %3225 = vmatmul.mubr.bf16.vlgmr.msra.gmra.mxu1 %v1428_v4  ;;  %v3582_v4 = vld [vmem:[#allocation25 + $0x14] ss:$8 sps:$4 sm:$0xff]  }
 0x4dd   :  { %3249 = vmatpush3.bf16.msra.mxu1 %v3530_v3  ;;  %3264 = vmatprep.mubr.msk.bf16.mxu1 %vm4214_vm0, %v4213_v0  ;;  %v3577_v3 = vld [vmem:[#allocation25 + $0x20] ss:$8 sps:$4 sm:$0xff]  }
 0x4de   :  { %3250 = vmatprep.subr.bf16.mxu1 %v4213_v0 }
 0x4e1   :  { %3251 = vmatpush3.bf16.msra.mxu1 %v3531_v5  ;;  %v3580_v5 = vld [vmem:[#allocation25 + $0x10] ss:$8 sps:$4 sm:$0xff]  }
 0x4e2   :  { %3252 = vmatprep.subr.bf16.mxu1 %v4213_v0 }
 0x4e5   :  { %3253 = vmatpush3.bf16.msra.mxu1 %v3532_v6  ;;  %v3585_v6 = vld [vmem:[#allocation25 + $0x4] ss:$8 sps:$4 sm:$0xff]  }
 0x4e6   :  { %3254 = vmatprep.subr.bf16.mxu1 %v4213_v0 }
 0x4e9   :  { %3255 = vmatpush3.bf16.msra.mxu1 %v3533_v7  ;;  %v3583_v7 = vld [vmem:[#allocation25] ss:$8 sps:$4 sm:$0xff]  }
 0x4ea   :  { %3256 = vmatprep.subr.bf16.mxu1 %v4213_v0 }
 0x4ed   :  { %3257 = vmatpush3.bf16.msra.mxu1 %v3534_v9  ;;  %v4601_v9 = vand.u32 127, %v759_v37 }
 0x4ee   :  { %3258 = vmatprep.subr.bf16.mxu1 %v4213_v0 }
 0x4ef   :  { %vm1656_vm1 = vcmp.lt.s32.totalorder %v4601_v9, 10 }
 0x4f1   :  { %3259 = vmatpush3.bf16.msra.mxu1 %v3535_v11  ;;  %v2911_v11 = vld [vmem:[%s4703_s1] ss:$0 sm:$0xff] }
 0x4f2   :  { %3260 = vmatprep.subr.bf16.mxu1 %v4213_v0 }
 0x4f5   :  { %3261 = vmatpush3.bf16.msra.mxu1 %v3536_v14 }
 0x4f6   :  { %3262 = vmatprep.subr.bf16.mxu1 %v4213_v0 }
 0x4f9   :  { %3263 = vmatpush3.bf16.msra.mxu1 %v3537_v15 }
 0x4fa   :  { %2006 = vmatprep.subr.bf16.mxu1 %v3564_v57  ;;  %v3608_v57 = vld [vmem:[#allocation34 + $0xcc] ss:$20 sps:$4 sm:$0xff]  }
 0x4fc   :  { %3265 = vmatmul.mubr.bf16.vlgmr.msra.gmra.mxu1 %v4532_v12 }
 0x4fd   :  { %2038 = vmatprep.mubr.bf16.mxu1 %v4215_v8  ;;  %2007 = vmatpush1.bf16.msra.mxu1 %v3562_v56  ;;  %v3603_v56 = vld [vmem:[#allocation34 + $0xf8] ss:$20 sps:$4 sm:$0xff]  }
 0x4fe   :  { %2008 = vmatprep.subr.bf16.mxu1 %v3567_v58  ;;  %v3611_v58 = vld [vmem:[#allocation34 + $0xd4] ss:$20 sps:$4 sm:$0xff]  }
 0x501   :  { %2009 = vmatpush1.bf16.msra.mxu1 %v3565_v59  ;;  %v3606_v59 = vld [vmem:[#allocation34 + $0xc8] ss:$20 sps:$4 sm:$0xff]  }
 0x502   :  { %2010 = vmatprep.subr.bf16.mxu1 %v3570_v60  ;;  %v3614_v60 = vld [vmem:[#allocation34 + $0xa4] ss:$20 sps:$4 sm:$0xff]  }
 0x505   :  { %2011 = vmatpush1.bf16.msra.mxu1 %v3568_v61  ;;  %v3612_v61 = vld [vmem:[#allocation34 + $0xa0] ss:$20 sps:$4 sm:$0xff]  }
 0x506   :  { %2012 = vmatprep.subr.bf16.mxu1 %v3573_v62  ;;  %v3615_v62 = vld [vmem:[#allocation34 + $0xa8] ss:$20 sps:$4 sm:$0xff]  }
 0x509   :  { %2013 = vmatpush1.bf16.msra.mxu1 %v3571_v63  ;;  %v3617_v63 = vld [vmem:[#allocation34 + $0xac] ss:$20 sps:$4 sm:$0xff]  }
 0x50a   :  { %2014 = vmatprep.subr.bf16.mxu1 %v3576_v1  ;;  %v3620_v1 = vld [vmem:[#allocation34 + $0x7c] ss:$20 sps:$4 sm:$0xff]  }
 0x59c   :  { %v1534_v19 = vpop.f32.mrf.mxu1 }
 0x59d   :  { %v1535_v20 = vadd.f32 %v2902_v18, %v1534_v19 }
 0x59e   :  { %v3226_v21 = vpop.f32.mrf.mxu1 }
 0x59f   :  { %v1540_v22 = vmul.f32 0.01, %v1535_v20 }
 0x5a0   :  { %v1537_v23 = vpop.f32.mrf.mxu1 }
 0x5a1   :  { %v1541_v13 = vmax.f32 %v1535_v20, %v1540_v22  ;;  %v2929_v20 = vld [vmem:[#allocation24] ss:$0 sm:$0xff] }
 0x5a2   :  { %v3227_v25 = vpop.f32.mrf.mxu1 }
 0x5a3   :  { %v1542_v12 = vpack.c.bf16 %v1541_v13, %v1541_v13 }
 0x5a5   :  { %3245 = vmatmul.mubr.bf16.vlgmr.msra.gmra.mxu0 %v1542_v12  ;;  %v3586_v12 = vld [vmem:[#allocation31 + $0x38] sm:$0xff]  }
 0x5a6   :  { %3269 = vmatpush3.bf16.msra.mxu0 %v3546_v26  ;;  %3284 = vmatprep.mubr.msk.bf16.mxu0 %vm4214_vm0, %v4213_v0 }
 0x5a7   :  { %3270 = vmatprep.subr.bf16.mxu0 %v4213_v0 }
 0x5aa   :  { %3271 = vmatpush3.bf16.msra.mxu0 %v3547_v27 }
 0x5ab   :  { %3272 = vmatprep.subr.bf16.mxu0 %v4213_v0 }
 0x5ae   :  { %3273 = vmatpush3.bf16.msra.mxu0 %v3548_v28  ;;  %v3587_v28 = vld [vmem:[#allocation31 + $0x30] sm:$0xff]  }
 0x5af   :  { %3274 = vmatprep.subr.bf16.mxu0 %v4213_v0 }
 0x5b2   :  { %3275 = vmatpush3.bf16.msra.mxu0 %v3549_v29  ;;  %v3588_v29 = vld [vmem:[#allocation31 + $0x28] sm:$0xff]  }
 0x5b3   :  { %3276 = vmatprep.subr.bf16.mxu0 %v4213_v0 }
 0x5b6   :  { %3277 = vmatpush3.bf16.msra.mxu0 %v3550_v30  ;;  %v3589_v30 = vld [vmem:[#allocation31 + $0x20] sm:$0xff]  }
 0x5b7   :  { %3278 = vmatprep.subr.bf16.mxu0 %v4213_v0 }
 0x5ba   :  { %3279 = vmatpush3.bf16.msra.mxu0 %v3551_v31  ;;  %v3590_v31 = vld [vmem:[#allocation31 + $0x18] sm:$0xff]  }
 0x5bb   :  { %3280 = vmatprep.subr.bf16.mxu0 %v4213_v0 }
 0x5bc   :  { %v1775_v33 = vpop.f32.mrf.mxu1 }
 0x5bd   :  { %v1776_v34 = vadd.f32 %v2920_v24, %v1775_v33  ;;  %v3591_v24 = vld [vmem:[#allocation31 + $0x10] sm:$0xff]   ;;  %v3592_v33 = vld [vmem:[#allocation31 + $0x8] sm:$0xff]  }
 0x5be   :  { %v3266_v35 = vpop.f32.mrf.mxu1  ;;  %3281 = vmatpush3.bf16.msra.mxu0 %v3552_v32  ;;  %v2956_v32 = vld [vmem:[#allocation30] ss:$0 sm:$0xff] }
 0x5bf   :  { %v1781_v41 = vmul.f32 0.01, %v1776_v34  ;;  %3282 = vmatprep.subr.bf16.mxu0 %v4213_v0 }
 0x5c0   :  { %v1778_v44 = vpop.f32.mrf.mxu1 }
 0x5c1   :  { %v1782_v45 = vmax.f32 %v1776_v34, %v1781_v41  ;;  %v3593_v41 = vld [vmem:[#allocation31] sm:$0xff]  }
 0x5c2   :  { %v3267_v46 = vpop.f32.mrf.mxu1  ;;  %3283 = vmatpush3.bf16.msra.mxu0 %v3553_v36 }
 0x5c3   :  { %v1783_v48 = vpack.c.bf16 %v1782_v45, %v1782_v45  ;;  %3288 = vmatprep.subr.bf16.mxu0 %v4213_v0 }
 0x5c5   :  { %3285 = vmatmul.mubr.bf16.vlgmr.msra.gmra.mxu0 %v1783_v48 }
 0x5c6   :  { %3289 = vmatpush3.bf16.msra.mxu0 %v3554_v47  ;;  %3304 = vmatprep.mubr.msk.bf16.mxu0 %vm4214_vm0, %v4213_v0 }
 0x5c7   :  { %3290 = vmatprep.subr.bf16.mxu0 %v4213_v0 }
 0x5ca   :  { %3291 = vmatpush3.bf16.msra.mxu0 %v3555_v49  ;;  %v3596_v49 = vld [vmem:[#allocation34 + $0x11c] ss:$20 sps:$4 sm:$0xff]  }
 0x5cb   :  { %3292 = vmatprep.subr.bf16.mxu0 %v4213_v0 }
 0x5ce   :  { %3293 = vmatpush3.bf16.msra.mxu0 %v3556_v50  ;;  %v3594_v50 = vld [vmem:[#allocation34 + $0x118] ss:$20 sps:$4 sm:$0xff]  }
 0x5cf   :  { %3294 = vmatprep.subr.bf16.mxu0 %v4213_v0 }
 0x5d2   :  { %3295 = vmatpush3.bf16.msra.mxu0 %v3557_v51  ;;  %v3597_v51 = vld [vmem:[#allocation34 + $0x120] ss:$20 sps:$4 sm:$0xff]  }
 0x5d3   :  { %3296 = vmatprep.subr.bf16.mxu0 %v4213_v0 }
 0x5d6   :  { %3297 = vmatpush3.bf16.msra.mxu0 %v3558_v52  ;;  %v3599_v52 = vld [vmem:[#allocation34 + $0x124] ss:$20 sps:$4 sm:$0xff]  }
 0x5d7   :  { %3298 = vmatprep.subr.bf16.mxu0 %v4213_v0 }
 0x5da   :  { %3299 = vmatpush3.bf16.msra.mxu0 %v3559_v53  ;;  %v3602_v53 = vld [vmem:[#allocation34 + $0xf4] ss:$20 sps:$4 sm:$0xff]  }
 0x5db   :  { %3300 = vmatprep.subr.bf16.mxu0 %v4213_v0 }
 0x5de   :  { %3301 = vmatpush3.bf16.msra.mxu0 %v3560_v54  ;;  %v3600_v54 = vld [vmem:[#allocation34 + $0xf0] ss:$20 sps:$4 sm:$0xff]  }
 0x5df   :  { %3302 = vmatprep.subr.bf16.mxu0 %v4213_v0 }
 0x5e2   :  { %3303 = vmatpush3.bf16.msra.mxu0 %v3561_v55  ;;  %v3605_v55 = vld [vmem:[#allocation34 + $0xfc] ss:$20 sps:$4 sm:$0xff]  }
 0x5e3   :  { %2608 = vmatprep.subr.bf16.mxu0 %v3596_v49 }
 0x5e5   :  { %3305 = vmatmul.mubr.bf16.vlgmr.msra.gmra.mxu0 %v4529_v10  ;;  %v3574_v10 = vld [vmem:[#allocation25 + $0x30] ss:$8 sps:$4 sm:$0xff]  }
 0x5e6   :  { %2640 = vmatprep.mubr.bf16.mxu0 %v4215_v8  ;;  %2015 = vmatpush1.bf16.msra.mxu1 %v3574_v10  ;;  %v3618_v10 = vld [vmem:[#allocation34 + $0x78] ss:$20 sps:$4 sm:$0xff]  }
 0x5e7   :  { %2016 = vmatprep.subr.bf16.mxu1 %v3579_v2  ;;  %2609 = vmatpush1.bf16.msra.mxu0 %v3594_v50  ;;  %v3623_v2 = vld [vmem:[#allocation34 + $0x84] ss:$20 sps:$4 sm:$0xff]  }
 0x5e8   :  { %2610 = vmatprep.subr.bf16.mxu0 %v3602_v53 }
 0x5ea   :  { %2017 = vmatpush1.bf16.msra.mxu1 %v3577_v3  ;;  %v3621_v3 = vld [vmem:[#allocation34 + $0x80] ss:$20 sps:$4 sm:$0xff]  }
 0x5eb   :  { %2018 = vmatprep.subr.bf16.mxu1 %v3582_v4  ;;  %2611 = vmatpush1.bf16.msra.mxu0 %v3600_v54  ;;  %v3626_v4 = vld [vmem:[#allocation34 + $0x54] ss:$20 sps:$4 sm:$0xff]  }
 0x5ec   :  { %2612 = vmatprep.subr.bf16.mxu0 %v3608_v57 }
 0x5ee   :  { %2019 = vmatpush1.bf16.msra.mxu1 %v3580_v5  ;;  %v3629_v5 = vld [vmem:[#allocation34 + $0x5c] ss:$20 sps:$4 sm:$0xff]  }
 0x5ef   :  { %2020 = vmatprep.subr.bf16.mxu1 %v3585_v6  ;;  %2613 = vmatpush1.bf16.msra.mxu0 %v3606_v59  ;;  %v3624_v6 = vld [vmem:[#allocation34 + $0x50] ss:$20 sps:$4 sm:$0xff]  }
 0x5f0   :  { %2614 = vmatprep.subr.bf16.mxu0 %v3614_v60 }
 0x5f2   :  { %2021 = vmatpush1.bf16.msra.mxu1 %v3583_v7  ;;  %v3627_v7 = vld [vmem:[#allocation34 + $0x58] ss:$20 sps:$4 sm:$0xff]  }
 0x5f3   :  { %3308 = vmatprep.subr.bf16.mxu1 %v4213_v0  ;;  %2615 = vmatpush1.bf16.msra.mxu0 %v3612_v61 }
 0x5f4   :  { %2616 = vmatprep.subr.bf16.mxu0 %v3620_v1 }
 0x5f7   :  { %2617 = vmatpush1.bf16.msra.mxu0 %v3618_v10 }
 0x5f8   :  { %2618 = vmatprep.subr.bf16.mxu0 %v3626_v4 }
 0x5fb   :  { %2619 = vmatpush1.bf16.msra.mxu0 %v3624_v6  ;;  %v3644_v6 = vld [vmem:[#allocation34 + $0xd8] ss:$20 sps:$4 sm:$0xff]  }
 0x665   :  { %v1648_v14 = vpop.f32.mrf.mxu0 }
 0x666   :  { %v1649_v15 = vadd.f32 %v2911_v11, %v1648_v14  ;;  %v3632_v11 = vld [vmem:[#allocation34 + $0x2c] ss:$20 sps:$4 sm:$0xff]   ;;  %v3630_v14 = vld [vmem:[#allocation34 + $0x28] ss:$20 sps:$4 sm:$0xff]  }
 0x667   :  { %v3246_v16 = vpop.f32.mrf.mxu0  ;;  %2620 = vmatprep.subr.bf16.mxu0 %v3632_v11  ;;  %v3646_v11 = vld [vmem:[#allocation34 + $0x88] ss:$20 sps:$4 sm:$0xff]  }
 0x668   :  { %v4607_v17 = vsel %vm1656_vm1, %v1649_v15, -1e+30  ;;  %v3635_v15 = vld [vmem:[#allocation34 + $0x34] ss:$20 sps:$4 sm:$0xff]   ;;  %v3633_v16 = vld [vmem:[#allocation34 + $0x30] ss:$20 sps:$4 sm:$0xff]   ;;  %2621 = vmatpush1.bf16.msra.mxu0 %v3630_v14 }
 0x669   :  { %1658 = vmax.xlane.f32.xlu0 %v4607_v17  ;;  %v1651_v18 = vpop.f32.mrf.mxu0  ;;  %v3647_v14 = vld [vmem:[#allocation34 + $0x60] ss:$20 sps:$4 sm:$0xff]  }
 0x66a   :  { %v3638_v18 = vld [vmem:[#allocation34 + $0x4] ss:$20 sps:$4 sm:$0xff]  }
 0x66b   :  { %v3247_v19 = vpop.f32.mrf.mxu0  ;;  %2622 = vmatprep.subr.bf16.mxu0 %v3638_v18  ;;  %v3649_v18 = vld [vmem:[#allocation34 + $0x10] ss:$20 sps:$4 sm:$0xff]  }
 0x66c   :  { %v3636_v19 = vld [vmem:[#allocation34] ss:$20 sps:$4 sm:$0xff]  }
 0x66d   :  { %2623 = vmatpush1.bf16.msra.mxu0 %v3636_v19 }
 0x66e   :  { %3328 = vmatprep.subr.bf16.mxu0 %v4213_v0 }
 0x685   :  { %v1889_v21 = vpop.f32.mrf.mxu0 }
 0x686   :  { %v1890_v22 = vadd.f32 %v2929_v20, %v1889_v21  ;;  %v3641_v20 = vld [vmem:[#allocation34 + $0xc] ss:$20 sps:$4 sm:$0xff]  }
 0x687   :  { %v3286_v23 = vpop.f32.mrf.mxu0 }
 0x688   :  { %v1895_v37 = vmul.f32 0.01, %v1890_v22 }
 0x689   :  { %v1892_v13 = vpop.f32.mrf.mxu0 }
 0x68a   :  { %v1896_v25 = vmax.f32 %v1890_v22, %v1895_v37  ;;  %v3639_v22 = vld [vmem:[#allocation34 + $0x8] ss:$20 sps:$4 sm:$0xff]  }
 0x68b   :  { %v3287_v26 = vpop.f32.mrf.mxu0 }
 0x68c   :  { %v1897_v27 = vpack.c.bf16 %v1896_v25, %v1896_v25  ;;  %v2049_v25 = vld [vmem:[%s4704_s23] sm:$0x3] }
 0x68d   :  { %v2052_v26 = vsub.f32 0.0, %v2049_v25  ;;  %v2076_v50 = vrot.slane %v2049_v25, %v4509_v39  ;;  %v2080_v53 = vrot.slane %v2049_v25, %v4513_v42 }
 0x68e   :  { %2039 = vmatmul.mubr.bf16.vlgmr.msra.gmra.mxu1 %v1897_v27  ;;  %v1914_v27 = vld [vmem:[#allocation27] sm:$0x3] }
 0x68f   :  { %3309 = vmatpush3.bf16.msra.mxu1 %v3586_v12  ;;  %3324 = vmatprep.mubr.msk.bf16.mxu1 %vm4214_vm0, %v4213_v0  ;;  %v2053_v12 = vmul.f32 1.442695, %v2052_v26 }
 0x690   :  { %3310 = vmatprep.subr.bf16.mxu1 %v4213_v0 }
 0x693   :  { %3311 = vmatpush3.bf16.msra.mxu1 %v3587_v28 }
 0x694   :  { %3312 = vmatprep.subr.bf16.mxu1 %v4213_v0 }
 0x697   :  { %3313 = vmatpush3.bf16.msra.mxu1 %v3588_v29  ;;  %v1923_v29 = vrot.slane %v1914_v27, %v4513_v42 }
 0x698   :  { %3314 = vmatprep.subr.bf16.mxu1 %v4213_v0 }
 0x69b   :  { %3315 = vmatpush3.bf16.msra.mxu1 %v3589_v30 }
 0x69c   :  { %3316 = vmatprep.subr.bf16.mxu1 %v4213_v0 }
 0x69f   :  { %3317 = vmatpush3.bf16.msra.mxu1 %v3590_v31 }
 0x6a0   :  { %3318 = vmatprep.subr.bf16.mxu1 %v4213_v0 }
 0x6a3   :  { %3319 = vmatpush3.bf16.msra.mxu1 %v3591_v24 }
 0x6a4   :  { %3320 = vmatprep.subr.bf16.mxu1 %v4213_v0 }
 0x6a5   :  { %v2202_v34 = vpop.f32.mrf.mxu0 }
 0x6a6   :  { %v2203_v35 = vadd.f32 %v2956_v32, %v2202_v34 }
 0x6a7   :  { %v3306_v36 = vpop.f32.mrf.mxu0  ;;  %3321 = vmatpush3.bf16.msra.mxu1 %v3592_v33  ;;  %v3660_v33 = vld [vmem:[%s4695_s15] sm:$0xff] }
 0x6a8   :  { %v2208_v44 = vmul.f32 0.01, %v2203_v35  ;;  %3322 = vmatprep.subr.bf16.mxu1 %v4213_v0 }
 0x6a9   :  { %v2205_v45 = vpop.f32.mrf.mxu0 }
 0x6aa   :  { %v2209_v46 = vmax.f32 %v2203_v35, %v2208_v44  ;;  %v3661_v45 = vld [vmem:[%s4695_s15 + $0x8] sm:$0xff] }
 0x6ab   :  { %v3307_v47 = vpop.f32.mrf.mxu0  ;;  %3323 = vmatpush3.bf16.msra.mxu1 %v3593_v41 }
 0x6ac   :  { %v2210_v48 = vpack.c.bf16 %v2209_v46, %v2209_v46  ;;  %2649 = vmatprep.subr.bf16.mxu1 %v3599_v52 }
 0x6ae   :  { %3325 = vmatmul.mubr.bf16.vlgmr.msra.gmra.mxu1 %v2210_v48 }
 0x6af   :  { %2681 = vmatprep.mubr.bf16.mxu1 %v4215_v8  ;;  %2650 = vmatpush1.bf16.msra.mxu1 %v3597_v51  ;;  %v3609_v8 = vld [vmem:[#allocation34 + $0xd0] ss:$20 sps:$4 sm:$0xff]  }
 0x6b0   :  { %2651 = vmatprep.subr.bf16.mxu1 %v3605_v55 }
 0x6b3   :  { %2652 = vmatpush1.bf16.msra.mxu1 %v3603_v56 }
 0x6b4   :  { %2653 = vmatprep.subr.bf16.mxu1 %v3611_v58 }
 0x6b7   :  { %2654 = vmatpush1.bf16.msra.mxu1 %v3609_v8  ;;  %v2965_v8 = vld [vmem:[#allocation33] ss:$0 sm:$0xff] }
 0x6b8   :  { %2655 = vmatprep.subr.bf16.mxu1 %v3617_v63 }
 0x6bb   :  { %2656 = vmatpush1.bf16.msra.mxu1 %v3615_v62 }
 0x6bc   :  { %2657 = vmatprep.subr.bf16.mxu1 %v3623_v2 }
 0x6bf   :  { %2658 = vmatpush1.bf16.msra.mxu1 %v3621_v3  ;;  %v3642_v3 = vld [vmem:[#allocation34 + $0x128] ss:$20 sps:$4 sm:$0xff]  }
 0x6c0   :  { %2659 = vmatprep.subr.bf16.mxu1 %v3629_v5  ;;  %v3643_v5 = vld [vmem:[#allocation34 + $0x100] ss:$20 sps:$4 sm:$0xff]  }
 0x6c3   :  { %2660 = vmatpush1.bf16.msra.mxu1 %v3627_v7  ;;  %v3645_v7 = vld [vmem:[#allocation34 + $0xb0] ss:$20 sps:$4 sm:$0xff]  }
 0x6c4   :  { %2661 = vmatprep.subr.bf16.mxu1 %v3635_v15  ;;  %v3648_v15 = vld [vmem:[#allocation34 + $0x38] ss:$20 sps:$4 sm:$0xff]  }
 0x6c7   :  { %2662 = vmatpush1.bf16.msra.mxu1 %v3633_v16 }
 0x6c8   :  { %2663 = vmatprep.subr.bf16.mxu1 %v3641_v20 }
 0x6cb   :  { %2664 = vmatpush1.bf16.msra.mxu1 %v3639_v22 }
 0x6f2   :  { %v1659_v21 = vpop.xlane.xlu0 %1658 }
 0x6f3   :  { %v1660_v23 = vsub.f32 %v4607_v17, %v1659_v21  ;;  %v1919_v17 = vrot.slane %v1914_v27, %v4509_v39 }
 0x6f5   :  { %v1661_v37 = vmul.f32 1.442695, %v1660_v23 }
 0x6f7   :  { %3654 = vpow2.f32 %v1661_v37  ;;  %v2373_v37 = vld [vmem:[#allocation36] sm:$0x1f] }
 0x6f8   :  { %3656 = vpow2.f32 %v2053_v12  ;;  %v2378_v25 = vrot.slane %v2373_v37, %v4509_v39  ;;  %v2390_v9 = vrot.slane %v2373_v37, %v773_v43 }
 0x704   :  { %v4622_v13 = vpop.eup %3654 }
 0x705   :  { %1663 = vadd.xlane.f32.xlu0 %v4622_v13  ;;  %v3657_v28 = vpop.eup %3656 }
 0x706   :  { %v2059_v24 = vrot.slane %v3657_v28, %v4509_v39  ;;  %v2063_v36 = vrot.slane %v3657_v28, %v4513_v42 }
 0x74e   :  { %v2040_v30 = vpop.f32.mrf.mxu1 }
 0x74f   :  { %v2041_v31 = vadd.f32 %v2040_v30, %v1919_v17 }
 0x750   :  { %v2042_v32 = vpop.f32.mrf.mxu1 }
 0x751   :  { %2047 = vst [vmem:[%s4394_s6] sm:$0xff] %v2041_v31  ;;  %v2050_v34 = vsub.f32 %v3660_v33, %v2041_v31  ;;  %v2043_v35 = vadd.f32 %v2042_v32, %v1923_v29  ;;  %v2393_v32 = vsub.s32 4, %v4506_v38 }
 0x752   :  { %v2044_v41 = vpop.f32.mrf.mxu1 }
 0x753   :  { %v2066_v44 = vmul.f32 %v2059_v24, %v2050_v34  ;;  %2048 = vst [vmem:[%s4394_s6 + $0x8] sm:$0xff] %v2043_v35  ;;  %v2051_v46 = vsub.f32 %v3661_v45, %v2043_v35  ;;  %v2394_v43 = vrot.slane %v2373_v37, %v2393_v32 }
 0x754   :  { %v2045_v47 = vpop.f32.mrf.mxu1 }
 0x755   :  { %v2067_v48 = vmul.f32 %v2063_v36, %v2051_v46  ;;  %v2068_v49 = vmul.f32 -0.5, %v2066_v44 }
 0x757   :  { %v2069_v51 = vmul.f32 -0.5, %v2067_v48  ;;  %v2070_v52 = vmul.f32 %v2068_v49, %v2066_v44 }
 0x759   :  { %v2071_v54 = vmul.f32 %v2069_v51, %v2067_v48  ;;  %v2083_v55 = vsub.f32 %v2070_v52, %v2076_v50 }
 0x75b   :  { %v2084_v56 = vsub.f32 %v2071_v54, %v2080_v53  ;;  %v2954_v57 = vadd.f32 -0.9189385, %v2083_v55 }
 0x75d   :  { %v2955_v58 = vadd.f32 -0.9189385, %v2084_v56 }
 0x75f   :  { %v2092_v59 = vadd.f32 %v2955_v58, %v2954_v57 }
 0x761   :  { %2093 = vadd.xlane.f32.xlu1 %v2092_v59 }
 0x76e   :  { %v2316_v60 = vpop.f32.mrf.mxu1 }
 0x76f   :  { %v2317_v61 = vadd.f32 %v2965_v8, %v2316_v60 }
 0x770   :  { %v3326_v62 = vpop.f32.mrf.mxu1 }
 0x771   :  { %v2322_v63 = vmul.f32 0.01, %v2317_v61 }
 0x772   :  { %v2319_v1 = vpop.f32.mrf.mxu1 }
 0x773   :  { %v2323_v10 = vmax.f32 %v2317_v61, %v2322_v63 }
 0x774   :  { %v3327_v2 = vpop.f32.mrf.mxu1 }
 0x775   :  { %v2324_v4 = vpack.c.bf16 %v2323_v10, %v2323_v10 }
 0x777   :  { %2641 = vmatmul.mubr.bf16.vlgmr.msra.gmra.mxu0 %v2324_v4  ;;  %2682 = vmatmul.mubr.bf16.vlgmr.msra.gmra.mxu1 %v2324_v4 }
 0x778   :  { %3329 = vmatpush3.bf16.msra.mxu0 %v3642_v3  ;;  %3344 = vmatprep.mubr.msk.bf16.mxu0 %vm4214_vm0, %v4213_v0 }
 0x779   :  { %3330 = vmatprep.subr.bf16.mxu0 %v4213_v0 }
 0x77c   :  { %3331 = vmatpush3.bf16.msra.mxu0 %v3643_v5 }
 0x77d   :  { %3332 = vmatprep.subr.bf16.mxu0 %v4213_v0 }
 0x780   :  { %3333 = vmatpush3.bf16.msra.mxu0 %v3644_v6 }
 0x781   :  { %3334 = vmatprep.subr.bf16.mxu0 %v4213_v0 }
 0x784   :  { %3335 = vmatpush3.bf16.msra.mxu0 %v3645_v7 }
 0x785   :  { %3336 = vmatprep.subr.bf16.mxu0 %v4213_v0 }
 0x788   :  { %3337 = vmatpush3.bf16.msra.mxu0 %v3646_v11 }
 0x789   :  { %3338 = vmatprep.subr.bf16.mxu0 %v4213_v0 }
 0x78c   :  { %3339 = vmatpush3.bf16.msra.mxu0 %v3647_v14 }
 0x78d   :  { %3340 = vmatprep.subr.bf16.mxu0 %v4213_v0 }
 0x78e   :  { %v1664_v16 = vpop.xlane.xlu0 %1663 }
 0x78f   :  { %3658 = vrcp.f32 %v1664_v16 }
 0x790   :  { %3341 = vmatpush3.bf16.msra.mxu0 %v3648_v15 }
 0x791   :  { %3342 = vmatprep.subr.bf16.mxu0 %v4213_v0  ;;  %v2386_v0 = vrot.slane %v2373_v37, %v769_v40 }
 0x794   :  { %3343 = vmatpush3.bf16.msra.mxu0 %v3649_v18 }
 0x797   :  { %3345 = vmatmul.mubr.bf16.vlgmr.msra.gmra.mxu0 %v2324_v4 }
 0x79c   :  { %v3659_v19 = vpop.eup %3658 }
 0x79d   :  { %v1666_v20 = vmul.f32 %v3659_v19, %v4622_v13  ;;  %v2382_v13 = vrot.slane %v2373_v37, %v4513_v42 }
 0x79f   :  { %v1667_v21 = vadd.f32 1e-09, %v1666_v20 }
 0x7a1   :  { %v1668_v22 = vsel %vm1656_vm1, %v1667_v21, 0.0 }
 0x7a2   :  { %1669 = vst [vmem:[%s4389_s4] sm:$0xff] %v1668_v22 }
 0x7ea   :  { %v2094_v23 = vpop.xlane.xlu1 %2093 }
 0x7eb   :  { %2096 = vst.msk [vmem:[%s4404_s24] sm:$0xff] %vm2095_vm2, %v2094_v23 }
 0x837   :  { %v2642_v26 = vpop.f32.mrf.mxu0  ;;  %v2683_v12 = vpop.f32.mrf.mxu1 }
 0x838   :  { %v2643_v27 = vadd.f32 %v2642_v26, %v2378_v25  ;;  %v2684_v17 = vadd.f32 %v2683_v12, %v2386_v0 }
 0x839   :  { %v2644_v28 = vpop.f32.mrf.mxu0  ;;  %v2685_v29 = vpop.f32.mrf.mxu1 }
 0x83a   :  { %2730 = vst [vmem:[%s4399_s29] sm:$0xff] %v2643_v27  ;;  %2732 = vst [vmem:[%s4399_s29 + $0x10] sm:$0xff] %v2684_v17  ;;  %v2645_v39 = vadd.f32 %v2644_v28, %v2382_v13  ;;  %v2686_v30 = vadd.f32 %v2685_v29, %v2390_v9 }
 0x83b   :  { %v2646_v31 = vpop.f32.mrf.mxu0  ;;  %v2687_v24 = vpop.f32.mrf.mxu1 }
 0x83c   :  { %2731 = vst [vmem:[%s4399_s29 + $0x8] sm:$0xff] %v2645_v39  ;;  %2733 = vst [vmem:[%s4399_s29 + $0x18] sm:$0xff] %v2686_v30 }
 0x83d   :  { %v2647_v40 = vpop.f32.mrf.mxu0  ;;  %v2688_v42 = vpop.f32.mrf.mxu1 }
 0x857   :  { %v2724_v33 = vpop.f32.mrf.mxu0 }
 0x858   :  { %v2725_v34 = vadd.f32 %v2724_v33, %v2394_v43 }
 0x859   :  { %v3346_v35 = vpop.f32.mrf.mxu0 }
 0x85a   :  { %2734 = vst [vmem:[%s4399_s29 + $0x20] sm:$0xff] %v2725_v34 }
 0x85b   :  { %v2727_v36 = vpop.f32.mrf.mxu0 }
 0x85d   :  { %v3347_v41 = vpop.f32.mrf.mxu0 }
 0x85e   :  { %2763 = vsyncpa [#allocation3], 1 }
 0x85f   :  { %2764 = vsyncpa [#allocation5], 1 }
 0x860   :  { %2765 = vsyncpa [#allocation8], 1 }
 0x861   :  { %2766 = vsyncpa [#allocation11], 1 }
 0x862   :  { %2767 = vsyncpa [#allocation14], 1 }
 0x863   :  { %2768 = vsyncpa [#allocation17], 1 }
 0x864   :  { %2769 = vsyncpa [#allocation20], 1 }
 0x865   :  { %2770 = vsyncpa [#allocation23], 1 }
 0x866   :  { %2771 = vsyncpa [#allocation26], 1 }
 0x867   :  { %2772 = vsyncpa [#allocation29], 1 }
 0x868   :  { %2773 = vsyncpa [#allocation32], 1 }
 0x869   :  { %2774 = vsyncpa [#allocation35], 1 }

</bundles_post_ra>
